<compile_context>
chip_gen: v7x
topology: tpu7x:2x2x1
jax: 0.10.0
libtpu: 0.0.40
codegen_flags: <defaults>
</compile_context>

<pallas_src>
import math

import jax
import jax.numpy as jnp
from jax import lax
from jax.experimental import pallas as pl
from jax.experimental.pallas import tpu as pltpu

NEG_SLOPE = 0.01  # default negative_slope of nn.LeakyReLU / F.leaky_relu


def _lrelu(x):
    return jnp.where(x >= 0, x, NEG_SLOPE * x)


def _grid_factor(B, N):
    """2 'parallel' grid steps only where there are 2 TensorCores/chip (v7x)."""
    try:
        kind = jax.devices()[0].device_kind.lower()
    except Exception:
        kind = ""
    two_tc = "v7" in kind
    if two_tc and B >= 2 and B % 2 == 0 and ((B // 2) * N) % 8 == 0:
        return 2
    return 1


def _pack_weights(params, H2, H, F_out, F_store):
    """Concatenate all dense weights/biases into one [R, WCOL] slab.

    Returns (slab, offsets) where offsets[name] = (row0, nrows, ncols)."""
    w1t = params['w1'][:H2]          # rows multiplying node_enc
    w1b = params['w1'][H2:]          # rows multiplying edge_agg
    w3p = jnp.pad(params['w3'], ((0, 0), (0, F_store - F_out)))
    b3p = jnp.pad(params['b3'], ((0, 0), (0, F_store - F_out)))
    mats = [('nw', params['nw']), ('nb', params['nb']),
            ('w1t', w1t), ('w1b', w1b), ('b1', params['b1']),
            ('w2', params['w2']), ('b2', params['b2']),
            ('w3', w3p), ('b3', b3p)]
    wcol = max(m.shape[1] for _, m in mats)
    offs, rows, r = {}, [], 0
    for name, m in mats:
        offs[name] = (r, m.shape[0], m.shape[1])
        rows.append(jnp.pad(m, ((0, 0), (0, wcol - m.shape[1]))))
        r += m.shape[0]
    slab = jnp.concatenate(rows, axis=0).astype(jnp.float32)
    return slab, offs


def _make_kernel(N, H2, H, F_store, Bb, offs):
    """Per-grid-step kernel: Bb samples per step, all sizes static."""

    def kernel(node_num_ref,                    # SMEM [B] int32 (scalar prefetch)
               adj_ref,                         # [Bb, N, N]
               nf_ref,                          # [Bb*N, 6]
               ef_ref,                          # [Bb, 2, N, N]
               ep_ref,                          # [H2, 3, 1]  (ew0 | ew1 | eb)
               w_ref,                           # [R, WCOL] packed weight slab
               o_ref):                          # [Bb*N, F_store]
        g = pl.program_id(0)

        def take(name):
            r0, nr, nc = offs[name]
            return w_ref[r0:r0 + nr, 0:nc]

        # --- feature mask from prefetched node_num: mask[b, n, 0] = (n < node_num[b])
        base = g * Bb
        parts = [jnp.full((1, 1, 1), node_num_ref[base + s], jnp.int32)
                 for s in range(Bb)]
        nn_vec = parts[0] if Bb == 1 else jnp.concatenate(parts, axis=0)   # [Bb,1,1]
        node_iota = lax.broadcasted_iota(jnp.int32, (Bb, N, 1), 1)
        mask = (node_iota < nn_vec).astype(jnp.float32)                    # [Bb,N,1]

        # --- node encoder: one stacked MXU dot over all Bb samples
        node_enc = _lrelu(
            jnp.dot(nf_ref[...], take('nw'), preferred_element_type=jnp.float32)
            + take('nb'))                                                  # [Bb*N, H2]
        node_enc = node_enc.reshape(Bb, N, H2)

        # --- edge encoder + aggregation, vectorized over samples.
        # Intermediate layout [Bb, H2, i, j]: destination-node axis j stays on
        # lanes (lane-dense at scale) and the sum over source nodes i is a
        # sublane reduce.  No relayout on the N^2-sized operands.
        adj = adj_ref[...]                                                 # [Bb,N,N]
        ep = ep_ref[...]                                                   # [H2,3,1]
        ew0 = ep[None, :, 0:1, :]                                          # [1,H2,1,1]
        ew1 = ep[None, :, 1:2, :]
        ebc = ep[None, :, 2:3, :]
        ef0 = ef_ref[:, 0:1, :, :]                                         # [Bb,1,N,N]
        ef1 = ef_ref[:, 1:2, :, :]
        z = ef0 * ew0 + ef1 * ew1 + ebc                                    # [Bb,H2,N,N]
        e = _lrelu(z) * adj[:, None, :, :]
        edge_agg = jnp.transpose(jnp.sum(e, axis=2), (0, 2, 1))            # [Bb,N,H2]

        # --- normalized adjacency, batched over samples.
        # D^-1/2 (A+I) D^-1/2 @ h  ==  dis * ((A+I) @ (dis * h))
        rr = lax.broadcasted_iota(jnp.int32, (N, N), 0)
        cc = lax.broadcasted_iota(jnp.int32, (N, N), 1)
        adj_sl = jnp.where((rr == cc)[None, :, :], 1.0, adj)               # [Bb,N,N]
        deg = jnp.maximum(jnp.sum(adj_sl, axis=-1, keepdims=True), 1.0)    # [Bb,N,1]
        dis = lax.rsqrt(deg)                                               # EUP

        def propagate(h, bias):      # h: [Bb,N,F]   bias: [1,F]
            y = dis * jnp.einsum('bnm,bmf->bnf', adj_sl, dis * h,
                                 preferred_element_type=jnp.float32)
            # dropout == identity (eval mode)
            return _lrelu((y + bias) * mask)

        # --- GCN layer 1 (concat-free: x @ w1 == node@w1_top + edge@w1_bot)
        xn = (node_enc * mask).reshape(Bb * N, H2)
        xe = (edge_agg * mask).reshape(Bb * N, H2)
        h1 = (jnp.dot(xn, take('w1t'), preferred_element_type=jnp.float32)
              + jnp.dot(xe, take('w1b'), preferred_element_type=jnp.float32))
        x1 = propagate(h1.reshape(Bb, N, H), take('b1'))                   # [Bb,N,H]

        # --- GCN layer 2
        h2 = jnp.dot(x1.reshape(Bb * N, H), take('w2'),
                     preferred_element_type=jnp.float32)
        x2 = propagate(h2.reshape(Bb, N, H), take('b2'))                   # [Bb,N,H]

        # --- GCN layer 3 (output columns zero-padded to a lane-dense width)
        h3 = jnp.dot(x2.reshape(Bb * N, H), take('w3'),
                     preferred_element_type=jnp.float32)
        x3 = propagate(h3.reshape(Bb, N, F_store), take('b3'))             # [Bb,N,Fp]

        o_ref[...] = x3.reshape(Bb * N, F_store)

    return kernel


def make_params(key, f_hidden, f_out):
    H2 = f_hidden // 2
    ks = jax.random.split(key, 7)

    def lin_init(k, fan_in, shape):
        bound = 1.0 / math.sqrt(fan_in)
        return jax.random.uniform(k, shape, jnp.float32, -bound, bound)

    def gcn_init(k, in_f, out_f):
        stdv = 1.0 / math.sqrt(out_f)
        kw, kb = jax.random.split(k)
        w = jax.random.uniform(kw, (in_f, out_f), jnp.float32, -stdv, stdv)
        b = jax.random.uniform(kb, (1, out_f), jnp.float32, -stdv, stdv)
        return w, b

    nw = lin_init(ks[0], 6, (6, H2))
    nb = lin_init(ks[1], 6, (1, H2))
    ew = lin_init(ks[2], 2, (2, H2))
    eb = lin_init(ks[3], 2, (1, H2))
    w1, b1 = gcn_init(ks[4], f_hidden, f_hidden)
    w2, b2 = gcn_init(ks[5], f_hidden, f_hidden)
    w3, b3 = gcn_init(ks[6], f_hidden, f_out)
    return dict(nw=nw, nb=nb, ew=ew, eb=eb,
                w1=w1, b1=b1, w2=w2, b2=b2, w3=w3, b3=b3)


def gnn_forward(params, adj, node_feat, edge_feat, node_num):
    B, N, _ = adj.shape
    H2 = params['nw'].shape[1]
    H = params['w1'].shape[0]
    F_out = params['w3'].shape[1]
    F_store = ((F_out + 127) // 128) * 128      # lane-dense output width

    G = _grid_factor(B, N)                      # 2 only on v7x (2 TensorCores)
    Bb = B // G

    # Wrapper-side layout plumbing (lane-dense slabs; no compute hoisted).
    adj = adj.astype(jnp.float32)
    nf_flat = node_feat.reshape(B * N, 6).astype(jnp.float32)
    ef_t = jnp.transpose(edge_feat, (0, 3, 1, 2)).astype(jnp.float32)   # [B,2,N,N]
    ep = jnp.stack([params['ew'][0], params['ew'][1], params['eb'][0]],
                   axis=1)[:, :, None].astype(jnp.float32)              # [H2,3,1]
    slab, offs = _pack_weights(params, H2, H, F_out, F_store)

    kernel = _make_kernel(N, H2, H, F_store, Bb, offs)

    in_specs = [
        pl.BlockSpec((Bb, N, N), lambda g, nn: (g, 0, 0)),              # adj
        pl.BlockSpec((Bb * N, 6), lambda g, nn: (g, 0)),                # node feats
        pl.BlockSpec((Bb, 2, N, N), lambda g, nn: (g, 0, 0, 0)),        # edge feats
        pl.BlockSpec(ep.shape, lambda g, nn: (0, 0, 0)),                # edge enc params
        pl.BlockSpec(slab.shape, lambda g, nn: (0, 0)),                 # packed weights
    ]
    out_spec = pl.BlockSpec((Bb * N, F_store), lambda g, nn: (g, 0))

    out_flat = pl.pallas_call(
        kernel,
        out_shape=jax.ShapeDtypeStruct((B * N, F_store), jnp.float32),
        grid_spec=pltpu.PrefetchScalarGridSpec(
            num_scalar_prefetch=1,
            grid=(G,),
            in_specs=in_specs,
            out_specs=out_spec,
        ),
        compiler_params=pltpu.CompilerParams(
            dimension_semantics=("parallel",)),
    )(node_num.astype(jnp.int32), adj, nf_flat, ef_t, ep, slab)

    return out_flat.reshape(B, N, F_store)[..., :F_out]


def gnn_reference(params, adj, nf, ef, node_num):
    """Pure-JAX mirror of the PyTorch forward (eval mode)."""
    B, N, _ = adj.shape
    node_enc = _lrelu(nf @ params['nw'] + params['nb'])
    edge_enc = _lrelu(jnp.einsum('bijc,ch->bijh', ef, params['ew']) + params['eb'])
    edge_enc = edge_enc * adj[..., None]
    edge_agg = edge_enc.sum(axis=1)
    x = jnp.concatenate([node_enc, edge_agg], axis=-1)
    mask = (jnp.arange(N)[None, :] < node_num[:, None]).astype(jnp.float32)
    x = x * mask[..., None]

    eye = jnp.eye(N)
    adj_sl = jnp.where(eye > 0, 1.0, adj)
    dis = jnp.clip(adj_sl.sum(-1), 1.0, None) ** -0.5
    adj_n = dis[:, :, None] * adj_sl * dis[:, None, :]

    def gcn(xin, w, b):
        h = jnp.einsum('bnm,bmf->bnf', adj_n, xin @ w) + b
        return h * mask[..., None]

    x1 = _lrelu(gcn(x, params['w1'], params['b1']))
    x2 = _lrelu(gcn(x1, params['w2'], params['b2']))
    x3 = _lrelu(gcn(x2, params['w3'], params['b3']))
    return x3


if __name__ == "__main__":
    B, N = 2, 16            # max_node_num == N for this synthetic config
    F_HIDDEN, F_OUT = 32, 16

    key = jax.random.PRNGKey(0)
    k_p, k_adj, k_nf, k_ef, k_nn = jax.random.split(key, 5)

    params = make_params(k_p, F_HIDDEN, F_OUT)

    adj = (jax.random.uniform(k_adj, (B, N, N)) < 0.3).astype(jnp.float32)
    node_feat = jax.random.normal(k_nf, (B, N, 6), jnp.float32)
    edge_feat = jax.random.normal(k_ef, (B, N, N, 2), jnp.float32)
    node_num = jax.random.randint(k_nn, (B,), 4, N + 1, dtype=jnp.int32)

    out = gnn_forward(params, adj, node_feat, edge_feat, node_num)
    out = jax.block_until_ready(out)

    ref = gnn_reference(params, adj, node_feat, edge_feat, node_num)
    assert out.shape == (B, N, F_OUT)
    err = jnp.max(jnp.abs(out - ref))
    assert jnp.allclose(out, ref, rtol=5e-3, atol=5e-3), f"max abs err = {err}"

    print("KERNEL_OK")
</pallas_src>

<mosaic_0001>
module attributes {stable_mosaic.version = 11 : i64} {
  func.func @kernel(%arg0: i32, %arg1: memref<2xi32, #tpu.memory_space<smem>>, %arg2: memref<2x16x16xf32, #tpu.memory_space<vmem>>, %arg3: memref<32x6xf32, #tpu.memory_space<vmem>>, %arg4: memref<2x2x16x16xf32, #tpu.memory_space<vmem>>, %arg5: memref<16x3x1xf32, #tpu.memory_space<vmem>>, %arg6: memref<106x128xf32, #tpu.memory_space<vmem>>, %arg7: memref<32x128xf32, #tpu.memory_space<vmem>>) attributes {dimension_semantics = [#tpu.dimension_semantics<parallel>], iteration_bounds = array<i64: 1>, scalar_prefetch = 1 : i64, scratch_operands = 0 : i64, tpu.core_type = #tpu.core_type<tc>, window_params = [{transform_indices = @transform_0, window_bounds = array<i64: 2, 16, 16>}, {transform_indices = @transform_1, window_bounds = array<i64: 32, 6>}, {transform_indices = @transform_2, window_bounds = array<i64: 2, 2, 16, 16>}, {pipeline_mode = #tpu.pipeline_mode<synchronous>, transform_indices = @transform_3, window_bounds = array<i64: 16, 3, 1>}, {pipeline_mode = #tpu.pipeline_mode<synchronous>, transform_indices = @transform_4, window_bounds = array<i64: 106, 128>}, {transform_indices = @transform_5, window_bounds = array<i64: 32, 128>}]} {
    %c2_i32 = arith.constant 2 : i32
    %0 = arith.muli %arg0, %c2_i32 : i32
    %c0_i32 = arith.constant 0 : i32
    %1 = arith.addi %0, %c0_i32 : i32
    %2 = arith.index_cast %1 : i32 to index
    %3 = memref.load %arg1[%2] : memref<2xi32, #tpu.memory_space<smem>>
    %4 = vector.broadcast %3 : i32 to vector<1x1x1xi32>
    %c1_i32 = arith.constant 1 : i32
    %5 = arith.addi %0, %c1_i32 : i32
    %6 = arith.index_cast %5 : i32 to index
    %7 = memref.load %arg1[%6] : memref<2xi32, #tpu.memory_space<smem>>
    %8 = vector.broadcast %7 : i32 to vector<1x1x1xi32>
    %9 = tpu.concatenate %4, %8 in 0 : vector<1x1x1xi32>, vector<1x1x1xi32> -> vector<2x1x1xi32>
    %10 = tpu.iota {dimensions = array<i32: 1>} : vector<2x16x1xi32>
    %11 = vector.broadcast %9 : vector<2x1x1xi32> to vector<2x16x1xi32>
    %12 = arith.cmpi slt, %10, %11 : vector<2x16x1xi32>
    %13 = arith.extui %12 : vector<2x16x1xi1> to vector<2x16x1xi32>
    %14 = arith.sitofp %13 : vector<2x16x1xi32> to vector<2x16x1xf32>
    %c0 = arith.constant 0 : index
    %c0_0 = arith.constant 0 : index
    %15 = vector.load %arg3[%c0, %c0_0] : memref<32x6xf32, #tpu.memory_space<vmem>>, vector<32x6xf32>
    %c0_1 = arith.constant 0 : index
    %c0_2 = arith.constant 0 : index
    %16 = vector.load %arg6[%c0_1, %c0_2] : memref<106x128xf32, #tpu.memory_space<vmem>>, vector<6x16xf32>
    %cst = arith.constant dense<0.000000e+00> : vector<32x16xf32>
    %17 = tpu.matmul %15, %16, %cst {dimension_numbers = #tpu.dot_dimension_numbers<[1], [0], [0], [1], [0, 0, 1, 1], [], []>} : vector<32x6xf32>, vector<6x16xf32>, vector<32x16xf32> -> vector<32x16xf32>
    %c6 = arith.constant 6 : index
    %c0_3 = arith.constant 0 : index
    %18 = vector.load %arg6[%c6, %c0_3] : memref<106x128xf32, #tpu.memory_space<vmem>>, vector<1x16xf32>
    %19 = vector.broadcast %18 : vector<1x16xf32> to vector<32x16xf32>
    %20 = arith.addf %17, %19 : vector<32x16xf32>
    %cst_4 = arith.constant 0.000000e+00 : f32
    %21 = vector.broadcast %cst_4 : f32 to vector<32x16xf32>
    %22 = arith.cmpf oge, %20, %21 : vector<32x16xf32>
    %cst_5 = arith.constant 0.00999999977 : f32
    %23 = vector.broadcast %cst_5 : f32 to vector<32x16xf32>
    %24 = arith.mulf %23, %20 : vector<32x16xf32>
    %25 = arith.select %22, %20, %24 : vector<32x16xi1>, vector<32x16xf32>
    %26 = vector.shape_cast %25 : vector<32x16xf32> to vector<2x16x16xf32>
    %c0_6 = arith.constant 0 : index
    %c0_7 = arith.constant 0 : index
    %c0_8 = arith.constant 0 : index
    %27 = vector.load %arg2[%c0_6, %c0_7, %c0_8] : memref<2x16x16xf32, #tpu.memory_space<vmem>>, vector<2x16x16xf32>
    %c0_9 = arith.constant 0 : index
    %c0_10 = arith.constant 0 : index
    %c0_11 = arith.constant 0 : index
    %28 = vector.load %arg5[%c0_9, %c0_10, %c0_11] : memref<16x3x1xf32, #tpu.memory_space<vmem>>, vector<16x3x1xf32>
    %29 = vector.extract_strided_slice %28 {offsets = [0, 0, 0], sizes = [16, 1, 1], strides = [1, 1, 1]} : vector<16x3x1xf32> to vector<16x1x1xf32>
    %30 = vector.shape_cast %29 : vector<16x1x1xf32> to vector<1x16x1x1xf32>
    %31 = vector.extract_strided_slice %28 {offsets = [0, 1, 0], sizes = [16, 1, 1], strides = [1, 1, 1]} : vector<16x3x1xf32> to vector<16x1x1xf32>
    %32 = vector.shape_cast %31 : vector<16x1x1xf32> to vector<1x16x1x1xf32>
    %33 = vector.extract_strided_slice %28 {offsets = [0, 2, 0], sizes = [16, 1, 1], strides = [1, 1, 1]} : vector<16x3x1xf32> to vector<16x1x1xf32>
    %34 = vector.shape_cast %33 : vector<16x1x1xf32> to vector<1x16x1x1xf32>
    %c0_12 = arith.constant 0 : index
    %c0_13 = arith.constant 0 : index
    %c0_14 = arith.constant 0 : index
    %c0_15 = arith.constant 0 : index
    %35 = vector.load %arg4[%c0_12, %c0_13, %c0_14, %c0_15] : memref<2x2x16x16xf32, #tpu.memory_space<vmem>>, vector<2x1x16x16xf32>
    %c0_16 = arith.constant 0 : index
    %c1 = arith.constant 1 : index
    %c0_17 = arith.constant 0 : index
    %c0_18 = arith.constant 0 : index
    %36 = vector.load %arg4[%c0_16, %c1, %c0_17, %c0_18] : memref<2x2x16x16xf32, #tpu.memory_space<vmem>>, vector<2x1x16x16xf32>
    %37 = vector.broadcast %35 : vector<2x1x16x16xf32> to vector<2x16x16x16xf32>
    %38 = vector.broadcast %30 : vector<1x16x1x1xf32> to vector<2x16x16x16xf32>
    %39 = arith.mulf %37, %38 : vector<2x16x16x16xf32>
    %40 = vector.broadcast %36 : vector<2x1x16x16xf32> to vector<2x16x16x16xf32>
    %41 = vector.broadcast %32 : vector<1x16x1x1xf32> to vector<2x16x16x16xf32>
    %42 = arith.mulf %40, %41 : vector<2x16x16x16xf32>
    %43 = arith.addf %39, %42 : vector<2x16x16x16xf32>
    %44 = vector.broadcast %34 : vector<1x16x1x1xf32> to vector<2x16x16x16xf32>
    %45 = arith.addf %43, %44 : vector<2x16x16x16xf32>
    %cst_19 = arith.constant 0.000000e+00 : f32
    %46 = vector.broadcast %cst_19 : f32 to vector<2x16x16x16xf32>
    %47 = arith.cmpf oge, %45, %46 : vector<2x16x16x16xf32>
    %cst_20 = arith.constant 0.00999999977 : f32
    %48 = vector.broadcast %cst_20 : f32 to vector<2x16x16x16xf32>
    %49 = arith.mulf %48, %45 : vector<2x16x16x16xf32>
    %50 = arith.select %47, %45, %49 : vector<2x16x16x16xi1>, vector<2x16x16x16xf32>
    %51 = vector.shape_cast %27 : vector<2x16x16xf32> to vector<2x1x16x16xf32>
    %52 = vector.broadcast %51 : vector<2x1x16x16xf32> to vector<2x16x16x16xf32>
    %53 = arith.mulf %50, %52 : vector<2x16x16x16xf32>
    %cst_21 = arith.constant dense<0.000000e+00> : vector<2x16x16xf32>
    %54 = vector.multi_reduction <add>, %53, %cst_21 [2] : vector<2x16x16x16xf32> to vector<2x16x16xf32>
    %55 = tpu.transpose %54, [0, 2, 1] : vector<2x16x16xf32> -> vector<2x16x16xf32>
    %56 = tpu.iota {dimensions = array<i32: 0>} : vector<16x16xi32>
    %57 = tpu.iota {dimensions = array<i32: 1>} : vector<16x16xi32>
    %58 = arith.cmpi eq, %56, %57 : vector<16x16xi32>
    %59 = vector.shape_cast %58 : vector<16x16xi1> to vector<1x16x16xi1>
    %cst_22 = arith.constant 1.000000e+00 : f32
    %60 = vector.shape_cast %59 : vector<1x16x16xi1> to vector<1x16x16xi1>
    %61 = vector.broadcast %60 : vector<1x16x16xi1> to vector<2x16x16xi1>
    %62 = vector.broadcast %cst_22 : f32 to vector<2x16x16xf32>
    %63 = arith.select %61, %62, %27 : vector<2x16x16xi1>, vector<2x16x16xf32>
    %cst_23 = arith.constant dense<0.000000e+00> : vector<2x16xf32>
    %64 = vector.multi_reduction <add>, %63, %cst_23 [2] : vector<2x16x16xf32> to vector<2x16xf32>
    %65 = vector.shape_cast %64 : vector<2x16xf32> to vector<2x16x1xf32>
    %cst_24 = arith.constant 1.000000e+00 : f32
    %66 = vector.broadcast %cst_24 : f32 to vector<2x16x1xf32>
    %67 = arith.maximumf %65, %66 : vector<2x16x1xf32>
    %68 = math.rsqrt %67 : vector<2x16x1xf32>
    %69 = vector.broadcast %14 : vector<2x16x1xf32> to vector<2x16x16xf32>
    %70 = arith.mulf %26, %69 : vector<2x16x16xf32>
    %71 = vector.shape_cast %70 : vector<2x16x16xf32> to vector<32x16xf32>
    %72 = vector.broadcast %14 : vector<2x16x1xf32> to vector<2x16x16xf32>
    %73 = arith.mulf %55, %72 : vector<2x16x16xf32>
    %74 = vector.shape_cast %73 : vector<2x16x16xf32> to vector<32x16xf32>
    %c7 = arith.constant 7 : index
    %c0_25 = arith.constant 0 : index
    %75 = vector.load %arg6[%c7, %c0_25] : memref<106x128xf32, #tpu.memory_space<vmem>>, vector<16x32xf32>
    %cst_26 = arith.constant dense<0.000000e+00> : vector<32x32xf32>
    %76 = tpu.matmul %71, %75, %cst_26 {dimension_numbers = #tpu.dot_dimension_numbers<[1], [0], [0], [1], [0, 0, 1, 1], [], []>} : vector<32x16xf32>, vector<16x32xf32>, vector<32x32xf32> -> vector<32x32xf32>
    %c23 = arith.constant 23 : index
    %c0_27 = arith.constant 0 : index
    %77 = vector.load %arg6[%c23, %c0_27] : memref<106x128xf32, #tpu.memory_space<vmem>>, vector<16x32xf32>
    %cst_28 = arith.constant dense<0.000000e+00> : vector<32x32xf32>
    %78 = tpu.matmul %74, %77, %cst_28 {dimension_numbers = #tpu.dot_dimension_numbers<[1], [0], [0], [1], [0, 0, 1, 1], [], []>} : vector<32x16xf32>, vector<16x32xf32>, vector<32x32xf32> -> vector<32x32xf32>
    %79 = arith.addf %76, %78 : vector<32x32xf32>
    %80 = vector.shape_cast %79 : vector<32x32xf32> to vector<2x16x32xf32>
    %c39 = arith.constant 39 : index
    %c0_29 = arith.constant 0 : index
    %81 = vector.load %arg6[%c39, %c0_29] : memref<106x128xf32, #tpu.memory_space<vmem>>, vector<1x32xf32>
    %82 = vector.broadcast %68 : vector<2x16x1xf32> to vector<2x16x32xf32>
    %83 = arith.mulf %82, %80 : vector<2x16x32xf32>
    "tpu.trace_start"() <{level = 10 : i32, message = "bnm,bmf->bnf"}> : () -> ()
    %cst_30 = arith.constant dense<0.000000e+00> : vector<2x16x32xf32>
    %84 = tpu.matmul %63, %83, %cst_30 {dimension_numbers = #tpu.dot_dimension_numbers<[2], [1], [1], [2], [0, 0, 0, 1, 1, 2], [0], [0]>} : vector<2x16x16xf32>, vector<2x16x32xf32>, vector<2x16x32xf32> -> vector<2x16x32xf32>
    "tpu.trace_stop"() : () -> ()
    %85 = vector.broadcast %68 : vector<2x16x1xf32> to vector<2x16x32xf32>
    %86 = arith.mulf %85, %84 : vector<2x16x32xf32>
    %87 = vector.shape_cast %81 : vector<1x32xf32> to vector<1x1x32xf32>
    %88 = vector.broadcast %87 : vector<1x1x32xf32> to vector<2x16x32xf32>
    %89 = arith.addf %86, %88 : vector<2x16x32xf32>
    %90 = vector.broadcast %14 : vector<2x16x1xf32> to vector<2x16x32xf32>
    %91 = arith.mulf %89, %90 : vector<2x16x32xf32>
    %cst_31 = arith.constant 0.000000e+00 : f32
    %92 = vector.broadcast %cst_31 : f32 to vector<2x16x32xf32>
    %93 = arith.cmpf oge, %91, %92 : vector<2x16x32xf32>
    %cst_32 = arith.constant 0.00999999977 : f32
    %94 = vector.broadcast %cst_32 : f32 to vector<2x16x32xf32>
    %95 = arith.mulf %94, %91 : vector<2x16x32xf32>
    %96 = arith.select %93, %91, %95 : vector<2x16x32xi1>, vector<2x16x32xf32>
    %97 = vector.shape_cast %96 : vector<2x16x32xf32> to vector<32x32xf32>
    %c40 = arith.constant 40 : index
    %c0_33 = arith.constant 0 : index
    %98 = vector.load %arg6[%c40, %c0_33] : memref<106x128xf32, #tpu.memory_space<vmem>>, vector<32x32xf32>
    %cst_34 = arith.constant dense<0.000000e+00> : vector<32x32xf32>
    %99 = tpu.matmul %97, %98, %cst_34 {dimension_numbers = #tpu.dot_dimension_numbers<[1], [0], [0], [1], [0, 0, 1, 1], [], []>} : vector<32x32xf32>, vector<32x32xf32>, vector<32x32xf32> -> vector<32x32xf32>
    %100 = vector.shape_cast %99 : vector<32x32xf32> to vector<2x16x32xf32>
    %c72 = arith.constant 72 : index
    %c0_35 = arith.constant 0 : index
    %101 = vector.load %arg6[%c72, %c0_35] : memref<106x128xf32, #tpu.memory_space<vmem>>, vector<1x32xf32>
    %102 = vector.broadcast %68 : vector<2x16x1xf32> to vector<2x16x32xf32>
    %103 = arith.mulf %102, %100 : vector<2x16x32xf32>
    "tpu.trace_start"() <{level = 10 : i32, message = "bnm,bmf->bnf"}> : () -> ()
    %cst_36 = arith.constant dense<0.000000e+00> : vector<2x16x32xf32>
    %104 = tpu.matmul %63, %103, %cst_36 {dimension_numbers = #tpu.dot_dimension_numbers<[2], [1], [1], [2], [0, 0, 0, 1, 1, 2], [0], [0]>} : vector<2x16x16xf32>, vector<2x16x32xf32>, vector<2x16x32xf32> -> vector<2x16x32xf32>
    "tpu.trace_stop"() : () -> ()
    %105 = vector.broadcast %68 : vector<2x16x1xf32> to vector<2x16x32xf32>
    %106 = arith.mulf %105, %104 : vector<2x16x32xf32>
    %107 = vector.shape_cast %101 : vector<1x32xf32> to vector<1x1x32xf32>
    %108 = vector.broadcast %107 : vector<1x1x32xf32> to vector<2x16x32xf32>
    %109 = arith.addf %106, %108 : vector<2x16x32xf32>
    %110 = vector.broadcast %14 : vector<2x16x1xf32> to vector<2x16x32xf32>
    %111 = arith.mulf %109, %110 : vector<2x16x32xf32>
    %cst_37 = arith.constant 0.000000e+00 : f32
    %112 = vector.broadcast %cst_37 : f32 to vector<2x16x32xf32>
    %113 = arith.cmpf oge, %111, %112 : vector<2x16x32xf32>
    %cst_38 = arith.constant 0.00999999977 : f32
    %114 = vector.broadcast %cst_38 : f32 to vector<2x16x32xf32>
    %115 = arith.mulf %114, %111 : vector<2x16x32xf32>
    %116 = arith.select %113, %111, %115 : vector<2x16x32xi1>, vector<2x16x32xf32>
    %117 = vector.shape_cast %116 : vector<2x16x32xf32> to vector<32x32xf32>
    %c73 = arith.constant 73 : index
    %c0_39 = arith.constant 0 : index
    %118 = vector.load %arg6[%c73, %c0_39] : memref<106x128xf32, #tpu.memory_space<vmem>>, vector<32x128xf32>
    %cst_40 = arith.constant dense<0.000000e+00> : vector<32x128xf32>
    %119 = tpu.matmul %117, %118, %cst_40 {dimension_numbers = #tpu.dot_dimension_numbers<[1], [0], [0], [1], [0, 0, 1, 1], [], []>} : vector<32x32xf32>, vector<32x128xf32>, vector<32x128xf32> -> vector<32x128xf32>
    %120 = vector.shape_cast %119 : vector<32x128xf32> to vector<2x16x128xf32>
    %c105 = arith.constant 105 : index
    %c0_41 = arith.constant 0 : index
    %121 = vector.load %arg6[%c105, %c0_41] : memref<106x128xf32, #tpu.memory_space<vmem>>, vector<1x128xf32>
    %122 = vector.broadcast %68 : vector<2x16x1xf32> to vector<2x16x128xf32>
    %123 = arith.mulf %122, %120 : vector<2x16x128xf32>
    "tpu.trace_start"() <{level = 10 : i32, message = "bnm,bmf->bnf"}> : () -> ()
    %cst_42 = arith.constant dense<0.000000e+00> : vector<2x16x128xf32>
    %124 = tpu.matmul %63, %123, %cst_42 {dimension_numbers = #tpu.dot_dimension_numbers<[2], [1], [1], [2], [0, 0, 0, 1, 1, 2], [0], [0]>} : vector<2x16x16xf32>, vector<2x16x128xf32>, vector<2x16x128xf32> -> vector<2x16x128xf32>
    "tpu.trace_stop"() : () -> ()
    %125 = vector.broadcast %68 : vector<2x16x1xf32> to vector<2x16x128xf32>
    %126 = arith.mulf %125, %124 : vector<2x16x128xf32>
    %127 = vector.shape_cast %121 : vector<1x128xf32> to vector<1x1x128xf32>
    %128 = vector.broadcast %127 : vector<1x1x128xf32> to vector<2x16x128xf32>
    %129 = arith.addf %126, %128 : vector<2x16x128xf32>
    %130 = vector.broadcast %14 : vector<2x16x1xf32> to vector<2x16x128xf32>
    %131 = arith.mulf %129, %130 : vector<2x16x128xf32>
    %cst_43 = arith.constant 0.000000e+00 : f32
    %132 = vector.broadcast %cst_43 : f32 to vector<2x16x128xf32>
    %133 = arith.cmpf oge, %131, %132 : vector<2x16x128xf32>
    %cst_44 = arith.constant 0.00999999977 : f32
    %134 = vector.broadcast %cst_44 : f32 to vector<2x16x128xf32>
    %135 = arith.mulf %134, %131 : vector<2x16x128xf32>
    %136 = arith.select %133, %131, %135 : vector<2x16x128xi1>, vector<2x16x128xf32>
    %137 = vector.shape_cast %136 : vector<2x16x128xf32> to vector<32x128xf32>
    %c0_45 = arith.constant 0 : index
    %c0_46 = arith.constant 0 : index
    %138 = vector.load %arg7[%c0_45, %c0_46] : memref<32x128xf32, #tpu.memory_space<vmem>>, vector<32x128xf32>
    tpu.vector_store %arg7[%c0_45, %c0_46], %137 {strides = array<i32>} : memref<32x128xf32, #tpu.memory_space<vmem>>, vector<32x128xf32>,
    return
  }
  func.func @transform_0(%arg0: i32, %arg1: memref<2xi32, #tpu.memory_space<smem>>) -> (i32, i32, i32) {
    %c0_i32 = arith.constant 0 : i32
    %c0_i32_0 = arith.constant 0 : i32
    %c0_i32_1 = arith.constant 0 : i32
    return %arg0, %c0_i32, %c0_i32_0 : i32, i32, i32
  }
  func.func @transform_1(%arg0: i32, %arg1: memref<2xi32, #tpu.memory_space<smem>>) -> (i32, i32) {
    %c0_i32 = arith.constant 0 : i32
    %c0_i32_0 = arith.constant 0 : i32
    return %arg0, %c0_i32 : i32, i32
  }
  func.func @transform_2(%arg0: i32, %arg1: memref<2xi32, #tpu.memory_space<smem>>) -> (i32, i32, i32, i32) {
    %c0_i32 = arith.constant 0 : i32
    %c0_i32_0 = arith.constant 0 : i32
    %c0_i32_1 = arith.constant 0 : i32
    %c0_i32_2 = arith.constant 0 : i32
    return %arg0, %c0_i32, %c0_i32_0, %c0_i32_1 : i32, i32, i32, i32
  }
  func.func @transform_3(%arg0: i32, %arg1: memref<2xi32, #tpu.memory_space<smem>>) -> (i32, i32, i32) {
    %c0_i32 = arith.constant 0 : i32
    %c0_i32_0 = arith.constant 0 : i32
    %c0_i32_1 = arith.constant 0 : i32
    %c0_i32_2 = arith.constant 0 : i32
    return %c0_i32, %c0_i32_0, %c0_i32_1 : i32, i32, i32
  }
  func.func @transform_4(%arg0: i32, %arg1: memref<2xi32, #tpu.memory_space<smem>>) -> (i32, i32) {
    %c0_i32 = arith.constant 0 : i32
    %c0_i32_0 = arith.constant 0 : i32
    %c0_i32_1 = arith.constant 0 : i32
    return %c0_i32, %c0_i32_0 : i32, i32
  }
  func.func @transform_5(%arg0: i32, %arg1: memref<2xi32, #tpu.memory_space<smem>>) -> (i32, i32) {
    %c0_i32 = arith.constant 0 : i32
    %c0_i32_0 = arith.constant 0 : i32
    return %arg0, %c0_i32 : i32, i32
  }
}

</mosaic_0001>

<bundles_post_ra>
// kernel: tpu_custom_call.1
= control target key start
LH: loop header
LB: loop body
LE: loop exit
PB: predicated region body
PF: predicated region fallthrough
CT: control target
= control target key end

     0   :  { %s4182_s0 = inlined_call_operand.vmem [shape: s32[2], index: 0, kind: input, shape index: {}]   ;;  %s4183_s1 = inlined_call_operand.hbm [shape: f32[2,16,16], index: 1, kind: input, shape index: {}]   ;;  %s4184_s2 = inlined_call_operand.vmem [shape: f32[32,6], index: 2, kind: input, shape index: {}]   ;;  %s4185_s3 = inlined_call_operand.hbm [shape: f32[2,2,16,16], index: 3, kind: input, shape index: {}]   ;;  %s4186_s4 = inlined_call_operand.vmem [shape: f32[16,3,1], index: 4, kind: input, shape index: {}]   ;;  %s4187_s5 = inlined_call_operand.vmem [shape: f32[106,128], index: 5, kind: input, shape index: {}]   ;;  %s4188_s6 = inlined_call_operand.hbm [shape: f32[32,128], index: 6, kind: output, shape index: {}]  }
   0x1   :  { %s11_s23 = sshll.u32 %s4182_s0, 4  ;;  %s12_s23 = int_to_ptr.vmem [resolvable:$true] %s11_s23 }
   0x2   :  { %s2784_s24 = scalar_lea.vmem %s12_s23, 16  ;;  %p2789_p1 = scmp.lt.s32.totalorder %s12_s23, %s12_s23 }
   0x3   :  { %p2785_p0 = scmp.ne.s32.totalorder %s12_s23, %s2784_s24  ;;  %p2790_p2 = scmp.lt.s32.totalorder %s2784_s24, %s2784_s24 }
   0x5   :  { %p2791_p3 = por %p2790_p2, %p2789_p1 }
   0x7   :  { %p2792_p4 = pnand %p2791_p3, %p2785_p0 }
   0x9   :  { %2795 = shalt.err (!%p2792_p4)  }
   0xa   :  { %s2870_s25 = smov [#allocation3]  }
   0xb   :  { %14 = dma.vmem_to_smem %s12_s23, 16, %s2870_s25, [#allocation2] }
   0xc   :  { %2862 = dma.done.wait [#allocation2], 16 }
   0xd   :  { %2863 = vsyncadd [#allocation2], 4294967280 }
   0xe   :  { %16 = sfence }
   0xf   :  { %17 = vsyncpa [#allocation5], 0 }
  0x10   :  { %18 = vsyncpa [#allocation8], 0 }
  0x11   :  { %19 = vsyncpa [#allocation6], 0  ;;  %s2871_s26 = smov [#allocation4]   ;;  %s2796_s29 = scalar_lea.hbm %s4183_s1, 512 }
  0x12   :  { %s25_s27 = sshll.u32 %s2871_s26, 4  ;;  %p2797_p5 = scmp.ne.s32.totalorder %s4183_s1, %s2796_s29  ;;  %s26_s27 = int_to_ptr.vmem [resolvable:$true] %s25_s27 }
  0x13   :  { %p2800_p6 = scmp.lt.u32.totalorder %s2796_s29, %s4183_s1 }
  0x15   :  { %p2802_p7 = pnand %p2800_p6, %p2797_p5 }
  0x17   :  { %2805 = shalt.err (!%p2802_p7)
}
  0x18   :  { %s2806_s10 = scalar_lea.vmem %s26_s27, 512  ;;  %p2811_p9 = scmp.lt.s32.totalorder %s26_s27, %s26_s27 }
  0x19   :  { %p2807_p8 = scmp.ne.s32.totalorder %s26_s27, %s2806_s10  ;;  %p2812_p10 = scmp.lt.s32.totalorder %s2806_s10, %s2806_s10 }
  0x1b   :  { %p2813_p11 = por %p2812_p10, %p2811_p9 }
  0x1d   :  { %p2814_p12 = pnand %p2813_p11, %p2807_p8 }
  0x1f   :  { %2817 = shalt.err (!%p2814_p12)
}
  0x20   :  { %s2872_s11 = smov 128   ;;  %s2873_s12 = smov 8  }
  0x21   :  { %31 = dma.hbm_to_vmem [thread:$0]  %s4183_s1, 512, %s26_s27, [#allocation5], %s2872_s11, %s2872_s11, %s2873_s12  }
  0x22   :  { %s2874_s15 = smov [#allocation7]   ;;  %s2818_s19 = scalar_lea.hbm %s4185_s3, 1024 }
  0x23   :  { %s39_s16 = sshll.u32 %s2874_s15, 4  ;;  %p2819_p13 = scmp.ne.s32.totalorder %s4185_s3, %s2818_s19  ;;  %s40_s16 = int_to_ptr.vmem [resolvable:$true] %s39_s16 }
  0x24   :  { %p2822_p0 = scmp.lt.u32.totalorder %s2818_s19, %s4185_s3 }
  0x26   :  { %p2824_p1 = pnand %p2822_p0, %p2819_p13 }
  0x28   :  { %2827 = shalt.err (!%p2824_p1)
}
  0x29   :  { %s2828_s24 = scalar_lea.vmem %s40_s16, 1024  ;;  %p2833_p3 = scmp.lt.s32.totalorder %s40_s16, %s40_s16 }
  0x2a   :  { %p2829_p2 = scmp.ne.s32.totalorder %s40_s16, %s2828_s24  ;;  %p2834_p4 = scmp.lt.s32.totalorder %s2828_s24, %s2828_s24 }
  0x2c   :  { %p2835_p5 = por %p2834_p4, %p2833_p3 }
  0x2e   :  { %p2836_p6 = pnand %p2835_p5, %p2829_p2 }
  0x30   :  { %2839 = shalt.err (!%p2836_p6)
}
  0x31   :  { %45 = dma.hbm_to_vmem [thread:$0]  %s4185_s3, 1024, %s40_s16, [#allocation8], %s2872_s11, %s2872_s11, %s2873_s12  }
  0x32   :  { %2864 = dma.done.wait [#allocation5], 512  }
  0x33   :  { %2865 = vsyncadd [#allocation5], 4294966784 }
  0x34   :  { %2866 = dma.done.wait [#allocation8], 1024  }
  0x35   :  { %2867 = vsyncadd [#allocation8], 4294966272  ;;  %v2875_v0 = vmov 0   ;;  %vm106_vm0 = vcmask 1045504   ;;  %vm93_vm1 = vcmask 48128   ;;  %v4189_v1 = vlaneseq  ;;  %v83_v3 = vld [vmem:[%s4184_s2] sm:$0xff] }
  0x36   :  { %2761 = vset.pattern.permute.xlu0 %v2875_v0  ;;  %v87_v2 = vld [vmem:[%s4187_s5] sm:$0x3f]  ;;  %v84_v4 = vld [vmem:[%s4184_s2 + $0x8] sm:$0xff]  ;;  %s2955_s3 = sld [smem:[#allocation3]]  ;;  %2509 = vmatprep.mubr.msk.f32.mxu0 %vm93_vm1, %v83_v3  ;;  %v2989_v10 = vld [vmem:[%s4186_s4 + $0x10] sm:$0x7] }
  0x37   :  { %2507 = vmatprep.subr.msk.mxu0 %vm106_vm0, %v87_v2  ;;  %v2961_v5 = vld [vmem:[%s4186_s4] sm:$0x7]  ;;  %v2967_v6 = vld [vmem:[%s4186_s4 + $0x4] sm:$0x7]  ;;  %v2974_v7 = vld [vmem:[%s4186_s4 + $0x8] sm:$0x7] }
  0x38   :  { %2508 = vmatpush3.msk.msra.mxu0 %vm106_vm0, %v87_v2  ;;  %2657 = vpush %v2961_v5  ;;  %v2977_v8 = vshrl.u32 %v4189_v1, 7  ;;  %v2983_v9 = vld [vmem:[%s4186_s4 + $0xc] sm:$0x7]  ;;  %v2995_v11 = vld [vmem:[%s4186_s4 + $0x14] sm:$0x7]  ;;  %v86_v14 = vld [vmem:[%s4184_s2 + $0x18] sm:$0xff] }
  0x39   :  { %2510 = vmatmul.mubr.msk.f32.vlgmr.msra.gmra.mrb[0].mxu0 %vm93_vm1, %v84_v4  ;;  %2659 = vpush %v2967_v6  ;;  %v3001_v12 = vld [vmem:[%s4186_s4 + $0x18] sm:$0x7]  ;;  %v85_v13 = vld [vmem:[%s4184_s2 + $0x10] sm:$0xff]  ;;  %v3016_v16 = vld [vmem:[%s4186_s4 + $0x1c] sm:$0x7]  ;;  %v364_v24 = vrot.slane %v2961_v5, 1 }
  0x3a   :  { %4196 = vst [vmem:[#allocation14_spill] sm:$0xff] %v2977_v8  ;;  %2661 = vpush %v2974_v7  ;;  %v3010_v15 = vadd.s32 8, %v2977_v8  ;;  %2512 = vmatprep.mubr.msk.f32.mxu0 %vm93_vm1, %v85_v13  ;;  %v3024_v18 = vld [vmem:[%s4186_s4 + $0x20] sm:$0x7]  ;;  %v3031_v19 = vld [vmem:[%s4186_s4 + $0x24] sm:$0x7] }
  0x3b   :  { %2663 = vpush %v2983_v9  ;;  %v3037_v20 = vld [vmem:[%s4186_s4 + $0x28] sm:$0x7]  ;;  %v3045_v21 = vld [vmem:[%s4186_s4 + $0x2c] sm:$0x7]  ;;  %v3051_v22 = vld [vmem:[%s4186_s4 + $0x30] sm:$0x7] }
  0x3c   :  { %2665 = vpush %v2989_v10  ;;  %4197 = vst [vmem:[#allocation15_spill] sm:$0xff] %v3010_v15  ;;  %v58_v17 = vstv %s2955_s3  ;;  %v3057_v23 = vld [vmem:[%s4186_s4 + $0x34] sm:$0x7]  ;;  %v4190_v25 = vmov 0.0   ;;  %v3066_v28 = vld [vmem:[%s4186_s4 + $0x38] sm:$0x7] }
  0x3d   :  { %2667 = vpush %v2995_v11  ;;  %2513 = vmatmul.mubr.msk.f32.gmra.mrb[2].mxu0 %vm93_vm1, %v86_v14  ;;  %vm71_vm2 = vcmp.lt.s32.totalorder %v2977_v8, %v58_v17  ;;  %vm72_vm3 = vcmp.lt.s32.totalorder %v3010_v15, %v58_v17  ;;  %v365_v29 = vrot.slane %v2967_v6, 1  ;;  %v3073_v31 = vld [vmem:[%s4186_s4 + $0x3c] sm:$0x7]  ;;  %v366_v32 = vrot.slane %v2974_v7, 1  ;;  %v3106_v62 = vld [vmem:[#allocation7] sm:$0xff]  ;;  %v3108_v63 = vld [vmem:[#allocation7 + $0x8] sm:$0xff] }
  0x3e   :  { %2669 = vpush %v3001_v12  ;;  %v2409_v26 = vsel %vm71_vm2, 1.0, %v4190_v25  ;;  %v2410_v27 = vsel %vm72_vm3, 1.0, %v4190_v25  ;;  %v367_v33 = vrot.slane %v2983_v9, 1  ;;  %v368_v34 = vrot.slane %v2989_v10, 1  ;;  %v3110_v0 = vld [vmem:[#allocation7 + $0x20] sm:$0xff]  ;;  %v3112_v2 = vld [vmem:[#allocation7 + $0x28] sm:$0xff] }
  0x3f   :  { %2671 = vpush %v3016_v16  ;;  %v2762_v30 = vpack.i.bf16 %v2410_v27, %v2409_v26  ;;  %v369_v35 = vrot.slane %v2995_v11, 1  ;;  %v370_v36 = vrot.slane %v3001_v12, 1  ;;  %v371_v37 = vrot.slane %v3016_v16, 1 }
  0x40   :  { %2673 = vpush %v3024_v18  ;;  %v372_v38 = vrot.slane %v3024_v18, 1  ;;  %v373_v39 = vrot.slane %v3031_v19, 1  ;;  %v374_v40 = vrot.slane %v3037_v20, 1  ;;  %v375_v41 = vrot.slane %v3045_v21, 1 }
  0x41   :  { %2675 = vpush %v3031_v19  ;;  %2763 = vperm.xlu0 %2761, %v2762_v30   ;;  %v376_v42 = vrot.slane %v3051_v22, 1  ;;  %v377_v43 = vrot.slane %v3057_v23, 1  ;;  %v378_v44 = vrot.slane %v3066_v28, 1  ;;  %v379_v45 = vrot.slane %v3073_v31, 1 }
  0x42   :  { %2677 = vpush %v3037_v20  ;;  %v556_v46 = vrot.slane %v2961_v5, 2  ;;  %v557_v47 = vrot.slane %v2967_v6, 2  ;;  %v558_v48 = vrot.slane %v2974_v7, 2  ;;  %v559_v49 = vrot.slane %v2983_v9, 2 }
  0x43   :  { %2679 = vpush %v3045_v21  ;;  %v560_v50 = vrot.slane %v2989_v10, 2  ;;  %v561_v51 = vrot.slane %v2995_v11, 2  ;;  %v562_v52 = vrot.slane %v3001_v12, 2  ;;  %v563_v53 = vrot.slane %v3016_v16, 2 }
  0x44   :  { %2681 = vpush %v3051_v22  ;;  %v564_v54 = vrot.slane %v3024_v18, 2  ;;  %v565_v55 = vrot.slane %v3031_v19, 2  ;;  %v566_v56 = vrot.slane %v3037_v20, 2  ;;  %v567_v57 = vrot.slane %v3045_v21, 2 }
  0x45   :  { %2683 = vpush %v3057_v23  ;;  %v568_v58 = vrot.slane %v3051_v22, 2  ;;  %v569_v59 = vrot.slane %v3057_v23, 2  ;;  %v570_v60 = vrot.slane %v3066_v28, 2  ;;  %v571_v61 = vrot.slane %v3073_v31, 2 }
  0x46   :  { %2685 = vpush %v3066_v28  ;;  %vm940_vm4 = vcmask 130048  }
  0x47   :  { %2687 = vpush %v3073_v31 }
  0x48   :  { %2689 = vpush %v364_v24 }
  0x49   :  { %2691 = vpush %v365_v29 }
  0x4a   :  { %2693 = vpush %v366_v32 }
  0x4b   :  { %2695 = vpush %v367_v33 }
  0x4c   :  { %2697 = vpush %v368_v34 }
  0x4d   :  { %2699 = vpush %v369_v35 }
  0x4e   :  { %2701 = vpush %v370_v36 }
  0x4f   :  { %2703 = vpush %v371_v37 }
  0x50   :  { %2705 = vpush %v372_v38 }
  0x51   :  { %2707 = vpush %v373_v39 }
  0x52   :  { %2709 = vpush %v374_v40 }
  0x53   :  { %2711 = vpush %v375_v41 }
  0x54   :  { %2713 = vpush %v376_v42 }
  0x55   :  { %2715 = vpush %v377_v43 }
  0x56   :  { %2717 = vpush %v378_v44 }
  0x57   :  { %2719 = vpush %v379_v45 }
  0x58   :  { %2721 = vpush %v556_v46 }
  0x59   :  { %2723 = vpush %v557_v47 }
  0x5a   :  { %2725 = vpush %v558_v48 }
  0x5b   :  { %2727 = vpush %v559_v49 }
  0x5c   :  { %2729 = vpush %v560_v50 }
  0x5d   :  { %2731 = vpush %v561_v51 }
  0x5e   :  { %2733 = vpush %v562_v52 }
  0x5f   :  { %2735 = vpush %v563_v53 }
  0x60   :  { %2737 = vpush %v564_v54 }
  0x61   :  { %2739 = vpush %v565_v55 }
  0x62   :  { %2741 = vpush %v566_v56 }
  0x63   :  { %2743 = vpush %v567_v57 }
  0x64   :  { %2745 = vpush %v568_v58 }
  0x65   :  { %2747 = vpush %v569_v59 }
  0x66   :  { %2749 = vpush %v570_v60 }
  0x67   :  { %2751 = vpush %v571_v61 }
  0x69   :  { %s2658_s4 = spop %2657 }
  0x6a   :  { %v238_v3 = vstv %s2658_s4  ;;  %s2660_s19 = spop %2659 }
  0x6b   :  { %s2662_s20 = spop %2661  ;;  %v3115_v4 = vmul.f32 %v238_v3, %v3106_v62  ;;  %v3118_v5 = vmul.f32 %v238_v3, %v3108_v63  ;;  %v242_v6 = vstv %s2660_s19  ;;  %v3121_v9 = vmul.f32 %v238_v3, %v3110_v0 }
  0x6c   :  { %v246_v7 = vstv %s2662_s20  ;;  %s2664_s21 = spop %2663  ;;  %v3124_v10 = vmul.f32 %v238_v3, %v3112_v2  ;;  %v3127_v11 = vmul.f32 %v242_v6, %v3106_v62  ;;  %v3130_v12 = vmul.f32 %v242_v6, %v3108_v63 }
  0x6d   :  { %s2666_s22 = spop %2665  ;;  %v3133_v13 = vmul.f32 %v242_v6, %v3110_v0  ;;  %v3136_v14 = vmul.f32 %v242_v6, %v3112_v2  ;;  %v3139_v16 = vmul.f32 %v246_v7, %v3106_v62  ;;  %v3142_v17 = vmul.f32 %v246_v7, %v3108_v63 }
  0x6e   :  { %s2668_s23 = spop %2667  ;;  %v3145_v18 = vmul.f32 %v246_v7, %v3110_v0  ;;  %v250_v19 = vstv %s2664_s21  ;;  %v254_v20 = vstv %s2666_s22  ;;  %v3148_v22 = vmul.f32 %v246_v7, %v3112_v2 }
  0x6f   :  { %v258_v21 = vstv %s2668_s23  ;;  %s2670_s24 = spop %2669  ;;  %v3151_v23 = vmul.f32 %v250_v19, %v3106_v62  ;;  %v3154_v24 = vmul.f32 %v250_v19, %v3108_v63  ;;  %v3157_v26 = vmul.f32 %v250_v19, %v3110_v0 }
  0x70   :  { %s2672_s1 = spop %2671  ;;  %v3160_v27 = vmul.f32 %v250_v19, %v3112_v2  ;;  %v3163_v28 = vmul.f32 %v254_v20, %v3106_v62  ;;  %v3166_v29 = vmul.f32 %v254_v20, %v3108_v63  ;;  %v3169_v30 = vmul.f32 %v254_v20, %v3110_v0 }
  0x71   :  { %s2674_s25 = spop %2673  ;;  %v3172_v31 = vmul.f32 %v254_v20, %v3112_v2  ;;  %v3175_v32 = vmul.f32 %v258_v21, %v3106_v62  ;;  %v3178_v33 = vmul.f32 %v258_v21, %v3108_v63  ;;  %v3181_v34 = vmul.f32 %v258_v21, %v3110_v0 }
  0x72   :  { %s2676_s26 = spop %2675  ;;  %v3184_v35 = vmul.f32 %v258_v21, %v3112_v2  ;;  %v262_v36 = vstv %s2670_s24  ;;  %v266_v37 = vstv %s2672_s1  ;;  %v270_v38 = vstv %s2674_s25 }
  0x73   :  { %s2678_s27 = spop %2677  ;;  %v3187_v39 = vmul.f32 %v262_v36, %v3106_v62  ;;  %v3190_v40 = vmul.f32 %v262_v36, %v3108_v63  ;;  %v3193_v41 = vmul.f32 %v262_v36, %v3110_v0  ;;  %v274_v42 = vstv %s2676_s26 }
  0x74   :  { %s2680_s0 = spop %2679  ;;  %v3196_v43 = vmul.f32 %v262_v36, %v3112_v2  ;;  %v3199_v44 = vmul.f32 %v266_v37, %v3106_v62  ;;  %v3202_v45 = vmul.f32 %v266_v37, %v3108_v63  ;;  %v3205_v46 = vmul.f32 %v266_v37, %v3110_v0 }
  0x75   :  { %4198 = vst [vmem:[#allocation16_spill] sm:$0xff] %v3187_v39  ;;  %4199 = vst [vmem:[#allocation17_spill] sm:$0xff] %v3190_v40  ;;  %s2682_s28 = spop %2681  ;;  %v3208_v47 = vmul.f32 %v266_v37, %v3112_v2  ;;  %v3211_v48 = vmul.f32 %v270_v38, %v3106_v62  ;;  %v3214_v49 = vmul.f32 %v270_v38, %v3108_v63  ;;  %v278_v56 = vstv %s2678_s27 }
  0x76   :  { %4200 = vst [vmem:[#allocation18_spill] sm:$0xff] %v3193_v41  ;;  %4201 = vst [vmem:[#allocation19_spill] sm:$0xff] %v3196_v43  ;;  %v3217_v50 = vmul.f32 %v270_v38, %v3110_v0  ;;  %s2684_s2 = spop %2683  ;;  %v3220_v51 = vmul.f32 %v270_v38, %v3112_v2  ;;  %v3223_v52 = vmul.f32 %v274_v42, %v3106_v62  ;;  %v282_v57 = vstv %s2680_s0 }
  0x77   :  { %4202 = vst [vmem:[#allocation20_spill] sm:$0xff] %v3199_v44  ;;  %4203 = vst [vmem:[#allocation21_spill] sm:$0xff] %v3202_v45  ;;  %v3226_v53 = vmul.f32 %v274_v42, %v3108_v63  ;;  %v3229_v54 = vmul.f32 %v274_v42, %v3110_v0  ;;  %s2686_s29 = spop %2685  ;;  %v3232_v55 = vmul.f32 %v274_v42, %v3112_v2  ;;  %v286_v58 = vstv %s2682_s28 }
  0x78   :  { %4204 = vst [vmem:[#allocation22_spill] sm:$0xff] %v3205_v46  ;;  %4205 = vst [vmem:[#allocation23_spill] sm:$0xff] %v3208_v47  ;;  %s2688_s30 = spop %2687  ;;  %v3235_v59 = vmul.f32 %v278_v56, %v3106_v62  ;;  %v3238_v60 = vmul.f32 %v278_v56, %v3108_v63  ;;  %v3241_v61 = vmul.f32 %v278_v56, %v3110_v0  ;;  %v290_v3 = vstv %s2684_s2 }
  0x79   :  { %4206 = vst [vmem:[#allocation24_spill] sm:$0xff] %v3211_v48  ;;  %4207 = vst [vmem:[#allocation25_spill] sm:$0xff] %v3214_v49  ;;  %s2690_s3 = spop %2689  ;;  %v3244_v6 = vmul.f32 %v278_v56, %v3112_v2  ;;  %v3247_v7 = vmul.f32 %v282_v57, %v3106_v62  ;;  %v3250_v19 = vmul.f32 %v282_v57, %v3108_v63  ;;  %v294_v15 = vstv %s2686_s29 }
  0x7a   :  { %4208 = vst [vmem:[#allocation26_spill] sm:$0xff] %v3217_v50  ;;  %4209 = vst [vmem:[#allocation27_spill] sm:$0xff] %v3220_v51  ;;  %v3253_v20 = vmul.f32 %v282_v57, %v3110_v0  ;;  %s2692_s7 = spop %2691  ;;  %v3256_v21 = vmul.f32 %v282_v57, %v3112_v2  ;;  %v3259_v36 = vmul.f32 %v286_v58, %v3106_v62  ;;  %v298_v8 = vstv %s2688_s30 }
  0x7b   :  { %4210 = vst [vmem:[#allocation28_spill] sm:$0xff] %v3223_v52  ;;  %4211 = vst [vmem:[#allocation29_spill] sm:$0xff] %v3226_v53  ;;  %v3262_v37 = vmul.f32 %v286_v58, %v3108_v63  ;;  %v3265_v38 = vmul.f32 %v286_v58, %v3110_v0  ;;  %s3267_s8 = spop %2693  ;;  %v3270_v42 = vmul.f32 %v286_v58, %v3112_v2  ;;  %v3288_v58 = vld [vmem:[#allocation7 + $0x18] sm:$0xff] }
  0x7c   :  { %4212 = vst [vmem:[#allocation30_spill] sm:$0xff] %v3229_v54  ;;  %4213 = vst [vmem:[#allocation31_spill] sm:$0xff] %v3232_v55  ;;  %v3273_v56 = vmul.f32 %v290_v3, %v3106_v62  ;;  %v3276_v57 = vmul.f32 %v290_v3, %v3108_v63  ;;  %v3279_v1 = vmul.f32 %v290_v3, %v3110_v0  ;;  %s3281_s9 = spop %2695 }
  0x7d   :  { %4214 = vst [vmem:[#allocation32_spill] sm:$0xff] %v3235_v59  ;;  %4215 = vst [vmem:[#allocation33_spill] sm:$0xff] %v3238_v60  ;;  %v3284_v25 = vmul.f32 %v290_v3, %v3112_v2  ;;  %s2698_s10 = spop %2697  ;;  %v3301_v3 = vld [vmem:[#allocation7 + $0x38] sm:$0xff] }
  0x7e   :  { %4216 = vst [vmem:[#allocation34_spill] sm:$0xff] %v3241_v61  ;;  %4217 = vst [vmem:[#allocation35_spill] sm:$0xff] %v3244_v6  ;;  %s2700_s13 = spop %2699 }
  0x7f   :  { %4218 = vst [vmem:[#allocation36_spill] sm:$0xff] %v3247_v7  ;;  %4219 = vst [vmem:[#allocation37_spill] sm:$0xff] %v3250_v19  ;;  %s3315_s14 = spop %2701  ;;  %v396_v7 = vstv %s2700_s13  ;;  %s3850_s13 = sld [smem:[#allocation3 + $0x1]] }
  0x80   :  { %4220 = vst [vmem:[#allocation38_spill] sm:$0xff] %v3253_v20  ;;  %4221 = vst [vmem:[#allocation39_spill] sm:$0xff] %v3256_v21  ;;  %v3307_v21 = vmul.f32 %v298_v8, %v3106_v62  ;;  %s3329_s15 = spop %2703  ;;  %v3390_v51 = vmul.f32 %v396_v7, %v3288_v58  ;;  %v3396_v50 = vmul.f32 %v396_v7, %v3301_v3  ;;  %v399_v49 = vstv %s3315_s14 }
  0x81   :  { %4222 = vst [vmem:[#allocation40_spill] sm:$0xff] %v3259_v36  ;;  %4223 = vst [vmem:[#allocation41_spill] sm:$0xff] %v3262_v37  ;;  %v3299_v37 = vmul.f32 %v294_v15, %v3110_v0  ;;  %v3304_v36 = vmul.f32 %v294_v15, %v3112_v2  ;;  %s2706_s16 = spop %2705  ;;  %v402_v48 = vstv %s3329_s15  ;;  %v3410_v43 = vmul.f32 %v399_v49, %v3301_v3 }
  0x82   :  { %4224 = vst [vmem:[#allocation42_spill] sm:$0xff] %v3265_v38  ;;  %4225 = vst [vmem:[#allocation43_spill] sm:$0xff] %v3270_v42  ;;  %v3286_v38 = vld [vmem:[#allocation7 + $0x10] sm:$0xff]  ;;  %s2708_s17 = spop %2707  ;;  %v405_v47 = vstv %s2706_s16  ;;  %v3416_v41 = vmul.f32 %v402_v48, %v3288_v58 }
  0x83   :  { %4226 = vst [vmem:[#allocation44_spill] sm:$0xff] %v3273_v56  ;;  %4227 = vst [vmem:[#allocation45_spill] sm:$0xff] %v3276_v57  ;;  %v3290_v42 = vld [vmem:[#allocation7 + $0x30] sm:$0xff]  ;;  %v381_v56 = vstv %s2690_s3  ;;  %v3293_v57 = vmul.f32 %v294_v15, %v3106_v62  ;;  %s3369_s18 = spop %2709  ;;  %v3387_v52 = vmul.f32 %v396_v7, %v3286_v38  ;;  %v3401_v46 = vmul.f32 %v399_v49, %v3286_v38 }
  0x84   :  { %4228 = vst [vmem:[#allocation46_spill] sm:$0xff] %v3279_v1  ;;  %4229 = vst [vmem:[#allocation47_spill] sm:$0xff] %v3284_v25  ;;  %v3296_v1 = vmul.f32 %v294_v15, %v3108_v63  ;;  %v384_v25 = vstv %s2692_s7  ;;  %v3321_v20 = vmul.f32 %v381_v56, %v3286_v38  ;;  %v3324_v15 = vmul.f32 %v381_v56, %v3288_v58  ;;  %s2712_s4 = spop %2711 }
  0x85   :  { %4230 = vst [vmem:[#allocation48_spill] sm:$0xff] %v3293_v57  ;;  %4232 = vst [vmem:[#allocation50_spill] sm:$0xff] %v3299_v37  ;;  %v3310_v57 = vmul.f32 %v298_v8, %v3108_v63  ;;  %v3318_v37 = vmul.f32 %v298_v8, %v3112_v2  ;;  %v3327_v62 = vmul.f32 %v381_v56, %v3290_v42  ;;  %v408_v44 = vstv %s2708_s17  ;;  %s2714_s19 = spop %2713 }
  0x86   :  { %4231 = vst [vmem:[#allocation49_spill] sm:$0xff] %v3296_v1  ;;  %4233 = vst [vmem:[#allocation51_spill] sm:$0xff] %v3304_v36  ;;  %v3313_v1 = vmul.f32 %v298_v8, %v3110_v0  ;;  %v3332_v63 = vmul.f32 %v381_v56, %v3301_v3  ;;  %v3335_v0 = vmul.f32 %v384_v25, %v3286_v38  ;;  %s2716_s20 = spop %2715 }
  0x87   :  { %4234 = vst [vmem:[#allocation52_spill] sm:$0xff] %v3307_v21  ;;  %4235 = vst [vmem:[#allocation53_spill] sm:$0xff] %v3310_v57  ;;  %v3338_v8 = vmul.f32 %v384_v25, %v3288_v58  ;;  %v3341_v2 = vmul.f32 %v384_v25, %v3290_v42  ;;  %v390_v57 = vstv %s3281_s9  ;;  %v393_v21 = vstv %s2698_s10  ;;  %s2718_s21 = spop %2717 }
  0x88   :  { %4236 = vst [vmem:[#allocation54_spill] sm:$0xff] %v3313_v1  ;;  %4237 = vst [vmem:[#allocation55_spill] sm:$0xff] %v3318_v37  ;;  %v3344_v37 = vmul.f32 %v384_v25, %v3301_v3  ;;  %v387_v1 = vstv %s3267_s8  ;;  %v3361_v25 = vmul.f32 %v390_v57, %v3286_v38  ;;  %v3364_v61 = vmul.f32 %v390_v57, %v3288_v58  ;;  %s2720_s22 = spop %2719 }
  0x89   :  { %v3349_v56 = vmul.f32 %v387_v1, %v3286_v38  ;;  %v3352_v36 = vmul.f32 %v387_v1, %v3288_v58  ;;  %v3355_v19 = vmul.f32 %v387_v1, %v3290_v42  ;;  %v3358_v6 = vmul.f32 %v387_v1, %v3301_v3  ;;  %4238 = vst [vmem:[#allocation56_spill] sm:$0xff] %v3396_v50  ;;  %s2722_s23 = spop %2721 }
  0x8a   :  { %v3367_v60 = vmul.f32 %v390_v57, %v3290_v42  ;;  %v3372_v59 = vmul.f32 %v390_v57, %v3301_v3  ;;  %v3375_v55 = vmul.f32 %v393_v21, %v3286_v38  ;;  %v3378_v1 = vmul.f32 %v393_v21, %v3288_v58  ;;  %4239 = vst [vmem:[#allocation57_spill] sm:$0xff] %v3401_v46  ;;  %s2724_s24 = spop %2723 }
  0x8b   :  { %v3381_v54 = vmul.f32 %v393_v21, %v3290_v42  ;;  %v3384_v53 = vmul.f32 %v393_v21, %v3301_v3  ;;  %v3393_v57 = vmul.f32 %v396_v7, %v3290_v42  ;;  %v3404_v21 = vmul.f32 %v399_v49, %v3288_v58  ;;  %4242 = vst [vmem:[#allocation60_spill] sm:$0xff] %v3410_v43  ;;  %s2726_s1 = spop %2725 }
  0x8c   :  { %v3407_v45 = vmul.f32 %v399_v49, %v3290_v42  ;;  %v3413_v7 = vmul.f32 %v402_v48, %v3286_v38  ;;  %4244 = vst [vmem:[#allocation62_spill] sm:$0xff] %v3416_v41  ;;  %v3419_v40 = vmul.f32 %v402_v48, %v3290_v42  ;;  %v3428_v46 = vmul.f32 %v405_v47, %v3288_v58  ;;  %s2728_s25 = spop %2727 }
  0x8d   :  { %4240 = vst [vmem:[#allocation58_spill] sm:$0xff] %v3404_v21  ;;  %v3422_v21 = vmul.f32 %v402_v48, %v3301_v3  ;;  %v3431_v49 = vmul.f32 %v405_v47, %v3290_v42  ;;  %v3437_v41 = vmul.f32 %v408_v44, %v3286_v38  ;;  %v3443_v48 = vmul.f32 %v408_v44, %v3290_v42  ;;  %s2730_s26 = spop %2729 }
  0x8e   :  { %4241 = vst [vmem:[#allocation59_spill] sm:$0xff] %v3407_v45  ;;  %4243 = vst [vmem:[#allocation61_spill] sm:$0xff] %v3413_v7  ;;  %v3425_v45 = vmul.f32 %v405_v47, %v3286_v38  ;;  %v3434_v7 = vmul.f32 %v405_v47, %v3301_v3  ;;  %v417_v43 = vstv %s2714_s19  ;;  %s2732_s27 = spop %2731 }
  0x8f   :  { %4245 = vst [vmem:[#allocation63_spill] sm:$0xff] %v3419_v40  ;;  %4246 = vst [vmem:[#allocation64_spill] sm:$0xff] %v3422_v21  ;;  %v3440_v40 = vmul.f32 %v408_v44, %v3288_v58  ;;  %v414_v21 = vstv %s2712_s4  ;;  %s2734_s0 = spop %2733 }
  0x90   :  { %4247 = vst [vmem:[#allocation65_spill] sm:$0xff] %v3425_v45  ;;  %4248 = vst [vmem:[#allocation66_spill] sm:$0xff] %v3428_v46  ;;  %v3446_v45 = vmul.f32 %v408_v44, %v3301_v3  ;;  %v411_v46 = vstv %s3369_s18  ;;  %v3462_v44 = vmul.f32 %v414_v21, %v3286_v38  ;;  %s2736_s28 = spop %2735 }
  0x91   :  { %4249 = vst [vmem:[#allocation67_spill] sm:$0xff] %v3431_v49  ;;  %4250 = vst [vmem:[#allocation68_spill] sm:$0xff] %v3434_v7  ;;  %v3450_v49 = vmul.f32 %v411_v46, %v3286_v38  ;;  %v3453_v47 = vmul.f32 %v411_v46, %v3288_v58  ;;  %v3459_v7 = vmul.f32 %v411_v46, %v3301_v3  ;;  %s2738_s2 = spop %2737 }
  0x92   :  { %4251 = vst [vmem:[#allocation69_spill] sm:$0xff] %v3437_v41  ;;  %4252 = vst [vmem:[#allocation70_spill] sm:$0xff] %v3440_v40  ;;  %v3456_v41 = vmul.f32 %v411_v46, %v3290_v42  ;;  %v420_v40 = vstv %s2716_s20  ;;  %v3480_v46 = vmul.f32 %v417_v43, %v3290_v42  ;;  %s2740_s29 = spop %2739 }
  0x93   :  { %4253 = vst [vmem:[#allocation71_spill] sm:$0xff] %v3443_v48  ;;  %4254 = vst [vmem:[#allocation72_spill] sm:$0xff] %v3446_v45  ;;  %v3465_v45 = vmul.f32 %v414_v21, %v3288_v58  ;;  %v3468_v48 = vmul.f32 %v414_v21, %v3290_v42  ;;  %s2742_s30 = spop %2741 }
  0x94   :  { %4255 = vst [vmem:[#allocation73_spill] sm:$0xff] %v3450_v49  ;;  %4256 = vst [vmem:[#allocation74_spill] sm:$0xff] %v3453_v47  ;;  %v3471_v49 = vmul.f32 %v414_v21, %v3301_v3  ;;  %v3474_v47 = vmul.f32 %v417_v43, %v3286_v38  ;;  %v3492_v21 = vmul.f32 %v420_v40, %v3290_v42  ;;  %s2744_s3 = spop %2743 }
  0x95   :  { %4257 = vst [vmem:[#allocation75_spill] sm:$0xff] %v3456_v41  ;;  %4258 = vst [vmem:[#allocation76_spill] sm:$0xff] %v3459_v7  ;;  %v3477_v41 = vmul.f32 %v417_v43, %v3288_v58  ;;  %s2746_s7 = spop %2745 }
  0x96   :  { %4259 = vst [vmem:[#allocation77_spill] sm:$0xff] %v3462_v44  ;;  %4260 = vst [vmem:[#allocation78_spill] sm:$0xff] %v3465_v45  ;;  %v3483_v44 = vmul.f32 %v417_v43, %v3301_v3  ;;  %v3486_v45 = vmul.f32 %v420_v40, %v3286_v38  ;;  %v3501_v43 = vmul.f32 %v420_v40, %v3301_v3  ;;  %s2748_s8 = spop %2747 }
  0x97   :  { %4261 = vst [vmem:[#allocation79_spill] sm:$0xff] %v3468_v48  ;;  %4262 = vst [vmem:[#allocation80_spill] sm:$0xff] %v3471_v49  ;;  %v3489_v48 = vmul.f32 %v420_v40, %v3288_v58  ;;  %v423_v49 = vstv %s2718_s21  ;;  %s2750_s9 = spop %2749 }
  0x98   :  { %4263 = vst [vmem:[#allocation81_spill] sm:$0xff] %v3474_v47  ;;  %4264 = vst [vmem:[#allocation82_spill] sm:$0xff] %v3477_v41  ;;  %v3494_v47 = vstv %s2720_s22  ;;  %v492_v41 = vadd.f32 %v3321_v20, %v3115_v4  ;;  %v524_v20 = vadd.f32 %v3327_v62, %v3121_v9  ;;  %v3541_v9 = vld [vmem:[#allocation4 + $0x10] sm:$0xff]  ;;  %v3543_v62 = vld [vmem:[#allocation4 + $0x18] sm:$0xff]  ;;  %s2752_s10 = spop %2751 }
  0x99   :  { %4265 = vst [vmem:[#allocation83_spill] sm:$0xff] %v3480_v46  ;;  %4266 = vst [vmem:[#allocation84_spill] sm:$0xff] %v3483_v44  ;;  %v493_v46 = vadd.f32 %v3324_v15, %v3118_v5  ;;  %v3513_v44 = vmul.f32 %v423_v49, %v3301_v3  ;;  %v3517_v4 = vmul.f32 %v3494_v47, %v3286_v38 }
  0x9a   :  { %4267 = vst [vmem:[#allocation85_spill] sm:$0xff] %v3486_v45  ;;  %4268 = vst [vmem:[#allocation86_spill] sm:$0xff] %v3489_v48  ;;  %v3504_v45 = vmul.f32 %v423_v49, %v3286_v38  ;;  %v3507_v48 = vmul.f32 %v423_v49, %v3288_v58  ;;  %v3521_v5 = vmul.f32 %v3494_v47, %v3288_v58 }
  0x9b   :  { %4269 = vst [vmem:[#allocation87_spill] sm:$0xff] %v3492_v21  ;;  %4270 = vst [vmem:[#allocation88_spill] sm:$0xff] %v3501_v43  ;;  %v3510_v21 = vmul.f32 %v423_v49, %v3290_v42  ;;  %v3525_v40 = vmul.f32 %v3494_v47, %v3290_v42  ;;  %v525_v15 = vadd.f32 %v3332_v63, %v3124_v10  ;;  %v573_v49 = vstv %s2722_s23 }
  0x9c   :  { %4271 = vst [vmem:[#allocation89_spill] sm:$0xff] %v3504_v45  ;;  %4272 = vst [vmem:[#allocation90_spill] sm:$0xff] %v3507_v48  ;;  %v494_v38 = vadd.f32 %v3335_v0, %v3127_v11  ;;  %v621_v58 = vadd.f32 %v573_v49, %v493_v46  ;;  %v526_v42 = vadd.f32 %v3341_v2, %v3133_v13  ;;  %v576_v0 = vstv %s2724_s24 }
  0x9d   :  { %4273 = vst [vmem:[#allocation91_spill] sm:$0xff] %v3510_v21  ;;  %4274 = vst [vmem:[#allocation92_spill] sm:$0xff] %v3513_v44  ;;  %v620_v44 = vadd.f32 %v573_v49, %v492_v41  ;;  %v652_v10 = vadd.f32 %v573_v49, %v524_v20  ;;  %v653_v63 = vadd.f32 %v573_v49, %v525_v15 }
  0x9e   :  { %4275 = vst [vmem:[#allocation93_spill] sm:$0xff] %v3517_v4  ;;  %4276 = vst [vmem:[#allocation94_spill] sm:$0xff] %v3521_v5  ;;  %v3533_v4 = vld [vmem:[#allocation4] sm:$0xff]  ;;  %v495_v5 = vadd.f32 %v3338_v8, %v3130_v12  ;;  %v527_v11 = vadd.f32 %v3344_v37, %v3136_v14  ;;  %vm685_vm6 = vcmp.ge.f32.partialorder %v621_v58, 0.0  ;;  %v749_v46 = vmul.f32 0.01, %v621_v58 }
  0x9f   :  { %4277 = vst [vmem:[#allocation95_spill] sm:$0xff] %v3525_v40  ;;  %v3539_v40 = vld [vmem:[#allocation4 + $0x8] sm:$0xff]  ;;  %vm684_vm5 = vcmp.ge.f32.partialorder %v620_v44, 0.0  ;;  %v748_v41 = vmul.f32 0.01, %v620_v44  ;;  %vm716_vm7 = vcmp.ge.f32.partialorder %v652_v10, 0.0  ;;  %v622_v21 = vadd.f32 %v576_v0, %v494_v38 }
  0xa0   :  { %vm717_vm8 = vcmp.ge.f32.partialorder %v653_v63, 0.0  ;;  %v780_v12 = vmul.f32 0.01, %v652_v10  ;;  %v781_v13 = vmul.f32 0.01, %v653_v63  ;;  %v813_v2 = vsel %vm685_vm6, %v621_v58, %v749_v46 }
  0xa1   :  { %v812_v8 = vsel %vm684_vm5, %v620_v44, %v748_v41  ;;  %v623_v48 = vadd.f32 %v576_v0, %v495_v5  ;;  %v877_v15 = vmul.f32 %v813_v2, %v3539_v40  ;;  %v654_v49 = vadd.f32 %v576_v0, %v526_v42 }
  0xa2   :  { %v844_v45 = vsel %vm716_vm7, %v652_v10, %v780_v12  ;;  %v845_v43 = vsel %vm717_vm8, %v653_v63, %v781_v13  ;;  %v876_v20 = vmul.f32 %v812_v8, %v3533_v4  ;;  %v655_v7 = vadd.f32 %v576_v0, %v527_v11 }
  0xa3   :  { %v908_v14 = vmul.f32 %v844_v45, %v3541_v9  ;;  %v909_v37 = vmul.f32 %v845_v43, %v3543_v62  ;;  %v942_v50 = vsel %vm940_vm4, %v877_v15, 0.0  ;;  %vm686_vm9 = vcmp.ge.f32.partialorder %v622_v21, 0.0 }
  0xa4   :  { %v941_v39 = vsel %vm940_vm4, %v876_v20, 0.0  ;;  %vm687_vm10 = vcmp.ge.f32.partialorder %v623_v48, 0.0  ;;  %vm718_vm11 = vcmp.ge.f32.partialorder %v654_v49, 0.0  ;;  %vm719_vm12 = vcmp.ge.f32.partialorder %v655_v7, 0.0 }
  0xa5   :  { %v943_v44 = vadd.f32 %v942_v50, %v941_v39  ;;  %v1085_v5 = vsel %vm940_vm4, %v908_v14, 0.0  ;;  %v1086_v38 = vsel %vm940_vm4, %v909_v37, 0.0  ;;  %v750_v10 = vmul.f32 0.01, %v622_v21 }
  0xa6   :  { %v1087_v58 = vadd.f32 %v1086_v38, %v1085_v5  ;;  %v751_v45 = vmul.f32 0.01, %v623_v48  ;;  %v782_v43 = vmul.f32 0.01, %v654_v49  ;;  %v783_v42 = vmul.f32 0.01, %v655_v7 }
  0xa7   :  { %v944_v63 = vrot.slane %v943_v44, 4  ;;  %v496_v11 = vadd.f32 %v3349_v56, %v3139_v16  ;;  %v814_v41 = vsel %vm686_vm9, %v622_v21, %v750_v10  ;;  %v497_v39 = vadd.f32 %v3352_v36, %v3142_v17 }
  0xa8   :  { %v1088_v0 = vrot.slane %v1087_v58, 4  ;;  %v815_v46 = vsel %vm687_vm10, %v623_v48, %v751_v45  ;;  %v846_v12 = vsel %vm718_vm11, %v654_v49, %v782_v43  ;;  %v847_v13 = vsel %vm719_vm12, %v655_v7, %v783_v42 }
  0xa9   :  { %v945_v50 = vadd.f32 %v944_v63, %v943_v44  ;;  %v878_v8 = vmul.f32 %v814_v41, %v3533_v4  ;;  %v879_v20 = vmul.f32 %v815_v46, %v3539_v40  ;;  %v910_v15 = vmul.f32 %v846_v12, %v3541_v9 }
  0xaa   :  { %v1089_v2 = vadd.f32 %v1088_v0, %v1087_v58  ;;  %v911_v14 = vmul.f32 %v847_v13, %v3543_v62  ;;  %v528_v48 = vadd.f32 %v3355_v19, %v3145_v18  ;;  %v529_v17 = vadd.f32 %v3358_v6, %v3148_v22 }
  0xab   :  { %v946_v16 = vrot.slane %v945_v50, 2  ;;  %v950_v56 = vsel %vm940_vm4, %v878_v8, 0.0  ;;  %v951_v7 = vsel %vm940_vm4, %v879_v20, 0.0  ;;  %v1094_v21 = vsel %vm940_vm4, %v910_v15, 0.0 }
  0xac   :  { %v1090_v36 = vrot.slane %v1089_v2, 2  ;;  %v1095_v37 = vsel %vm940_vm4, %v911_v14, 0.0  ;;  %v952_v44 = vadd.f32 %v951_v7, %v950_v56  ;;  %v579_v38 = vstv %s2726_s1 }
  0xad   :  { %v3571_v49 = vadd.f32 %v946_v16, %v945_v50  ;;  %v1096_v5 = vadd.f32 %v1095_v37, %v1094_v21  ;;  %v624_v10 = vadd.f32 %v579_v38, %v496_v11  ;;  %v625_v45 = vadd.f32 %v579_v38, %v497_v39 }
  0xae   :  { %v1091_v58 = vadd.f32 %v1090_v36, %v1089_v2  ;;  %v656_v63 = vadd.f32 %v579_v38, %v528_v48  ;;  %v953_v19 = vrot.slane %v952_v44, 4  ;;  %v657_v6 = vadd.f32 %v579_v38, %v529_v17 }
  0xaf   :  { %v948_v18 = vrot.slane %v3571_v49, 1  ;;  %v1097_v22 = vrot.slane %v1096_v5, 4  ;;  %vm688_vm13 = vcmp.ge.f32.partialorder %v624_v10, 0.0  ;;  %vm689_vm14 = vcmp.ge.f32.partialorder %v625_v45, 0.0 }
  0xb0   :  { %v1092_v43 = vrot.slane %v1091_v58, 1  ;;  %vm720_vm15 = vcmp.ge.f32.partialorder %v656_v63, 0.0  ;;  %v954_v42 = vadd.f32 %v953_v19, %v952_v44  ;;  %vm721_vm0 = vcmp.ge.f32.partialorder %v657_v6, 0.0 }
  0xb1   :  { %v1098_v0 = vadd.f32 %v1097_v22, %v1096_v5  ;;  %v752_v41 = vmul.f32 0.01, %v624_v10  ;;  %v3576_v46 = vmul.f32 %v3494_v47, %v3301_v3  ;;  %v753_v11 = vmul.f32 0.01, %v625_v45 }
  0xb2   :  { %v784_v39 = vmul.f32 0.01, %v656_v63  ;;  %v785_v50 = vmul.f32 0.01, %v657_v6  ;;  %v955_v12 = vrot.slane %v954_v42, 2  ;;  %v498_v2 = vadd.f32 %v3361_v25, %v3151_v23 }
  0xb3   :  { %v1099_v13 = vrot.slane %v1098_v0, 2  ;;  %v816_v8 = vsel %vm688_vm13, %v624_v10, %v752_v41  ;;  %v817_v20 = vsel %vm689_vm14, %v625_v45, %v753_v11  ;;  %v499_v23 = vadd.f32 %v3364_v61, %v3154_v24 }
  0xb4   :  { %v848_v15 = vsel %vm720_vm15, %v656_v63, %v784_v39  ;;  %v849_v14 = vsel %vm721_vm0, %v657_v6, %v785_v50  ;;  %v880_v16 = vmul.f32 %v816_v8, %v3533_v4  ;;  %v3581_v56 = vadd.f32 %v955_v12, %v954_v42 }
  0xb5   :  { %v1100_v48 = vadd.f32 %v1099_v13, %v1098_v0  ;;  %v881_v3 = vmul.f32 %v817_v20, %v3539_v40  ;;  %v912_v47 = vmul.f32 %v848_v15, %v3541_v9  ;;  %v913_v17 = vmul.f32 %v849_v14, %v3543_v62 }
  0xb6   :  { %v959_v36 = vsel %vm940_vm4, %v880_v16, 0.0  ;;  %v530_v25 = vadd.f32 %v3367_v60, %v3157_v26  ;;  %v3591_v7 = vadd.f32 %v1092_v43, %v1091_v58  ;;  %v531_v10 = vadd.f32 %v3372_v59, %v3160_v27 }
  0xb7   :  { %v960_v37 = vsel %vm940_vm4, %v881_v3, 0.0  ;;  %v1103_v44 = vsel %vm940_vm4, %v912_v47, 0.0  ;;  %v1104_v38 = vsel %vm940_vm4, %v913_v17, 0.0  ;;  %v582_v45 = vstv %s2728_s25 }
  0xb8   :  { %v961_v5 = vadd.f32 %v960_v37, %v959_v36  ;;  %v1101_v63 = vrot.slane %v1100_v48, 1  ;;  %v1105_v24 = vadd.f32 %v1104_v38, %v1103_v44  ;;  %v626_v61 = vadd.f32 %v582_v45, %v498_v2 }
  0xb9   :  { %v627_v19 = vadd.f32 %v582_v45, %v499_v23  ;;  %v658_v60 = vadd.f32 %v582_v45, %v530_v25  ;;  %v659_v58 = vadd.f32 %v582_v45, %v531_v10  ;;  %v500_v22 = vadd.f32 %v3375_v55, %v3163_v28 }
  0xba   :  { %v962_v26 = vrot.slane %v961_v5, 4  ;;  %v1106_v6 = vrot.slane %v1105_v24, 4  ;;  %vm690_vm1 = vcmp.ge.f32.partialorder %v626_v61, 0.0  ;;  %v754_v43 = vmul.f32 0.01, %v626_v61 }
  0xbb   :  { %vm691_vm2 = vcmp.ge.f32.partialorder %v627_v19, 0.0  ;;  %vm722_vm3 = vcmp.ge.f32.partialorder %v658_v60, 0.0  ;;  %vm723_vm5 = vcmp.ge.f32.partialorder %v659_v58, 0.0  ;;  %v755_v0 = vmul.f32 0.01, %v627_v19 }
  0xbc   :  { %v963_v42 = vadd.f32 %v962_v26, %v961_v5  ;;  %v1107_v27 = vadd.f32 %v1106_v6, %v1105_v24  ;;  %v786_v59 = vmul.f32 0.01, %v658_v60  ;;  %v787_v41 = vmul.f32 0.01, %v659_v58 }
  0xbd   :  { %v818_v11 = vsel %vm690_vm1, %v626_v61, %v754_v43  ;;  %v819_v50 = vsel %vm691_vm2, %v627_v19, %v755_v0  ;;  %v501_v13 = vadd.f32 %v3378_v1, %v3166_v29  ;;  %v3605_v20 = vadd.f32 %v1101_v63, %v1100_v48 }
  0xbe   :  { %v964_v39 = vrot.slane %v963_v42, 2  ;;  %v882_v12 = vmul.f32 %v818_v11, %v3533_v4  ;;  %v1108_v28 = vrot.slane %v1107_v27, 2  ;;  %v850_v55 = vsel %vm722_vm3, %v658_v60, %v786_v59 }
  0xbf   :  { %v851_v8 = vsel %vm723_vm5, %v659_v58, %v787_v41  ;;  %v883_v2 = vmul.f32 %v819_v50, %v3539_v40  ;;  %v914_v15 = vmul.f32 %v850_v55, %v3541_v9  ;;  %v532_v29 = vadd.f32 %v3381_v54, %v3169_v30 }
  0xc0   :  { %v915_v14 = vmul.f32 %v851_v8, %v3543_v62  ;;  %v968_v16 = vsel %vm940_vm4, %v882_v12, 0.0  ;;  %v3610_v3 = vadd.f32 %v1108_v28, %v1107_v27  ;;  %v533_v1 = vadd.f32 %v3384_v53, %v3172_v31 }
  0xc1   :  { %v969_v47 = vsel %vm940_vm4, %v883_v2, 0.0  ;;  %v1112_v48 = vsel %vm940_vm4, %v914_v15, 0.0  ;;  %v585_v23 = vstv %s2730_s26  ;;  %v3619_v25 = vadd.f32 %v964_v39, %v963_v42 }
  0xc2   :  { %v970_v17 = vadd.f32 %v969_v47, %v968_v16  ;;  %v1113_v36 = vsel %vm940_vm4, %v915_v14, 0.0  ;;  %v628_v44 = vadd.f32 %v585_v23, %v500_v22  ;;  %v629_v5 = vadd.f32 %v585_v23, %v501_v13 }
  0xc3   :  { %v1114_v37 = vadd.f32 %v1113_v36, %v1112_v48  ;;  %v660_v45 = vadd.f32 %v585_v23, %v532_v29  ;;  %v661_v63 = vadd.f32 %v585_v23, %v533_v1  ;;  %v502_v22 = vadd.f32 %v3387_v52, %v3175_v32  ;;  %v4279_v23 = vld [vmem:[#allocation16_spill] sm:$0xff] }
  0xc4   :  { %v971_v10 = vrot.slane %v970_v17, 4  ;;  %vm692_vm6 = vcmp.ge.f32.partialorder %v628_v44, 0.0  ;;  %vm693_vm7 = vcmp.ge.f32.partialorder %v629_v5, 0.0  ;;  %v756_v31 = vmul.f32 0.01, %v628_v44 }
  0xc5   :  { %v1115_v30 = vrot.slane %v1114_v37, 4  ;;  %vm724_vm8 = vcmp.ge.f32.partialorder %v660_v45, 0.0  ;;  %vm725_vm9 = vcmp.ge.f32.partialorder %v661_v63, 0.0  ;;  %v757_v54 = vmul.f32 0.01, %v629_v5 }
  0xc6   :  { %v3622_v53 = vadd.f32 %v971_v10, %v970_v17  ;;  %v788_v61 = vmul.f32 0.01, %v660_v45  ;;  %v789_v19 = vmul.f32 0.01, %v661_v63  ;;  %v820_v26 = vsel %vm692_vm6, %v628_v44, %v756_v31  ;;  %v4282_v10 = vld [vmem:[#allocation58_spill] sm:$0xff] }
  0xc7   :  { %v1116_v24 = vadd.f32 %v1115_v30, %v1114_v37  ;;  %v821_v60 = vsel %vm693_vm7, %v629_v5, %v757_v54  ;;  %v884_v58 = vmul.f32 %v820_v26, %v3533_v4  ;;  %v503_v6 = vadd.f32 %v3390_v51, %v3178_v33  ;;  %v4278_v33 = vld [vmem:[#allocation56_spill] sm:$0xff]  ;;  %v4280_v37 = vld [vmem:[#allocation57_spill] sm:$0xff]  ;;  %v4283_v54 = vld [vmem:[#allocation18_spill] sm:$0xff] }
  0xc8   :  { %v852_v42 = vsel %vm724_vm8, %v660_v45, %v788_v61  ;;  %v853_v0 = vsel %vm725_vm9, %v661_v63, %v789_v19  ;;  %v885_v27 = vmul.f32 %v821_v60, %v3539_v40  ;;  %v534_v39 = vadd.f32 %v3393_v57, %v3181_v34  ;;  %v4281_v5 = vld [vmem:[#allocation17_spill] sm:$0xff] }
  0xc9   :  { %v1117_v43 = vrot.slane %v1116_v24, 2  ;;  %v916_v59 = vmul.f32 %v852_v42, %v3541_v9  ;;  %v917_v41 = vmul.f32 %v853_v0, %v3543_v62  ;;  %v977_v11 = vsel %vm940_vm4, %v884_v58, 0.0  ;;  %v4285_v58 = vld [vmem:[#allocation19_spill] sm:$0xff]  ;;  %v4287_v0 = vld [vmem:[#allocation20_spill] sm:$0xff] }
  0xca   :  { %v978_v52 = vsel %vm940_vm4, %v885_v27, 0.0  ;;  %v535_v51 = vadd.f32 %v4278_v33, %v3184_v35  ;;  %v588_v50 = vstv %s2732_s27  ;;  %v504_v44 = vadd.f32 %v4280_v37, %v4279_v23  ;;  %v4288_v27 = vld [vmem:[#allocation61_spill] sm:$0xff] }
  0xcb   :  { %v3639_v12 = vadd.f32 %v978_v52, %v977_v11  ;;  %v1121_v13 = vsel %vm940_vm4, %v916_v59, 0.0  ;;  %v1122_v28 = vsel %vm940_vm4, %v917_v41, 0.0  ;;  %v630_v55 = vadd.f32 %v588_v50, %v502_v22  ;;  %v4286_v22 = vld [vmem:[#allocation60_spill] sm:$0xff]  ;;  %v4289_v41 = vld [vmem:[#allocation21_spill] sm:$0xff]  ;;  %v4290_v11 = vld [vmem:[#allocation62_spill] sm:$0xff] }
  0xcc   :  { %v1123_v8 = vadd.f32 %v1122_v28, %v1121_v13  ;;  %v631_v2 = vadd.f32 %v588_v50, %v503_v6  ;;  %v662_v15 = vadd.f32 %v588_v50, %v534_v39  ;;  %v663_v14 = vadd.f32 %v588_v50, %v535_v51 }
  0xcd   :  { %v3643_v34 = vadd.f32 %v1117_v43, %v1116_v24  ;;  %vm694_vm10 = vcmp.ge.f32.partialorder %v630_v55, 0.0  ;;  %v758_v16 = vmul.f32 0.01, %v630_v55  ;;  %v505_v45 = vadd.f32 %v4282_v10, %v4281_v5  ;;  %v4284_v24 = vld [vmem:[#allocation59_spill] sm:$0xff] }
  0xce   :  { %v1124_v47 = vrot.slane %v1123_v8, 4  ;;  %vm695_vm11 = vcmp.ge.f32.partialorder %v631_v2, 0.0  ;;  %vm726_vm12 = vcmp.ge.f32.partialorder %v662_v15, 0.0  ;;  %vm727_vm13 = vcmp.ge.f32.partialorder %v663_v14, 0.0 }
  0xcf   :  { %v759_v35 = vmul.f32 0.01, %v631_v2  ;;  %v790_v29 = vmul.f32 0.01, %v662_v15  ;;  %v791_v1 = vmul.f32 0.01, %v663_v14  ;;  %v822_v17 = vsel %vm694_vm10, %v630_v55, %v758_v16 }
  0xd0   :  { %v3646_v48 = vadd.f32 %v1124_v47, %v1123_v8  ;;  %v886_v36 = vmul.f32 %v822_v17, %v3533_v4  ;;  %v536_v61 = vadd.f32 %v4284_v24, %v4283_v54  ;;  %v537_v6 = vadd.f32 %v4286_v22, %v4285_v58  ;;  %v4291_v8 = vld [vmem:[#allocation22_spill] sm:$0xff] }
  0xd1   :  { %v823_v63 = vsel %vm695_vm11, %v631_v2, %v759_v35  ;;  %v854_v30 = vsel %vm726_vm12, %v662_v15, %v790_v29  ;;  %v855_v31 = vsel %vm727_vm13, %v663_v14, %v791_v1  ;;  %v591_v42 = vstv %s2734_s0  ;;  %v4292_v2 = vld [vmem:[#allocation63_spill] sm:$0xff]  ;;  %v4294_v1 = vld [vmem:[#allocation64_spill] sm:$0xff] }
  0xd2   :  { %v887_v19 = vmul.f32 %v823_v63, %v3539_v40  ;;  %v918_v26 = vmul.f32 %v854_v30, %v3541_v9  ;;  %v919_v60 = vmul.f32 %v855_v31, %v3543_v62  ;;  %v986_v43 = vsel %vm940_vm4, %v886_v36, 0.0  ;;  %v4293_v29 = vld [vmem:[#allocation23_spill] sm:$0xff] }
  0xd3   :  { %v506_v59 = vadd.f32 %v4288_v27, %v4287_v0  ;;  %v507_v39 = vadd.f32 %v4290_v11, %v4289_v41  ;;  %v632_v50 = vadd.f32 %v591_v42, %v504_v44  ;;  %v633_v28 = vadd.f32 %v591_v42, %v505_v45 }
  0xd4   :  { %v987_v52 = vsel %vm940_vm4, %v887_v19, 0.0  ;;  %v1130_v33 = vsel %vm940_vm4, %v918_v26, 0.0  ;;  %v1131_v51 = vsel %vm940_vm4, %v919_v60, 0.0  ;;  %v664_v55 = vadd.f32 %v591_v42, %v536_v61  ;;  %v4295_v26 = vld [vmem:[#allocation24_spill] sm:$0xff]  ;;  %v4296_v60 = vld [vmem:[#allocation65_spill] sm:$0xff] }
  0xd5   :  { %v3668_v13 = vadd.f32 %v1131_v51, %v1130_v33  ;;  %v538_v15 = vadd.f32 %v4292_v2, %v4291_v8  ;;  %v3672_v14 = vadd.f32 %v987_v52, %v986_v43  ;;  %v665_v16 = vadd.f32 %v591_v42, %v537_v6  ;;  %v4297_v33 = vld [vmem:[#allocation25_spill] sm:$0xff]  ;;  %v4298_v51 = vld [vmem:[#allocation66_spill] sm:$0xff]  ;;  %v4300_v2 = vld [vmem:[#allocation67_spill] sm:$0xff] }
  0xd6   :  { %vm696_vm14 = vcmp.ge.f32.partialorder %v632_v50, 0.0  ;;  %v760_v47 = vmul.f32 0.01, %v632_v50  ;;  %vm697_vm15 = vcmp.ge.f32.partialorder %v633_v28, 0.0  ;;  %vm728_vm0 = vcmp.ge.f32.partialorder %v664_v55, 0.0  ;;  %v4299_v8 = vld [vmem:[#allocation26_spill] sm:$0xff] }
  0xd7   :  { %v761_v35 = vmul.f32 0.01, %v633_v28  ;;  %v539_v17 = vadd.f32 %v4294_v1, %v4293_v29  ;;  %vm729_vm1 = vcmp.ge.f32.partialorder %v665_v16, 0.0  ;;  %v792_v36 = vmul.f32 0.01, %v664_v55 }
  0xd8   :  { %v793_v23 = vmul.f32 0.01, %v665_v16  ;;  %v824_v37 = vsel %vm696_vm14, %v632_v50, %v760_v47  ;;  %v594_v45 = vstv %s2736_s28  ;;  %v508_v58 = vadd.f32 %v4296_v60, %v4295_v26  ;;  %v4302_v47 = vld [vmem:[#allocation68_spill] sm:$0xff]  ;;  %v4306_v26 = vld [vmem:[#allocation70_spill] sm:$0xff] }
  0xd9   :  { %v825_v5 = vsel %vm697_vm15, %v633_v28, %v761_v35  ;;  %v888_v10 = vmul.f32 %v824_v37, %v3533_v4  ;;  %v856_v63 = vsel %vm728_vm0, %v664_v55, %v792_v36  ;;  %v634_v54 = vadd.f32 %v594_v45, %v506_v59 }
  0xda   :  { %v857_v30 = vsel %vm729_vm1, %v665_v16, %v793_v23  ;;  %v889_v31 = vmul.f32 %v825_v5, %v3539_v40  ;;  %v920_v24 = vmul.f32 %v856_v63, %v3541_v9  ;;  %v635_v19 = vadd.f32 %v594_v45, %v507_v39  ;;  %v4301_v16 = vld [vmem:[#allocation27_spill] sm:$0xff] }
  0xdb   :  { %v921_v61 = vmul.f32 %v857_v30, %v3543_v62  ;;  %v3684_v22 = vsel %vm940_vm4, %v888_v10, 0.0  ;;  %v666_v6 = vadd.f32 %v594_v45, %v538_v15  ;;  %v667_v43 = vadd.f32 %v594_v45, %v539_v17 }
  0xdc   :  { %vm698_vm2 = vcmp.ge.f32.partialorder %v634_v54, 0.0  ;;  %v1139_v42 = vsel %vm940_vm4, %v920_v24, 0.0  ;;  %vm699_vm3 = vcmp.ge.f32.partialorder %v635_v19, 0.0  ;;  %v762_v27 = vmul.f32 0.01, %v634_v54 }
  0xdd   :  { %v1140_v0 = vsel %vm940_vm4, %v921_v61, 0.0  ;;  %v3689_v59 = vsel %vm940_vm4, %v889_v31, 0.0  ;;  %vm730_vm5 = vcmp.ge.f32.partialorder %v666_v6, 0.0  ;;  %vm731_vm6 = vcmp.ge.f32.partialorder %v667_v43, 0.0  ;;  %v4303_v31 = vld [vmem:[#allocation28_spill] sm:$0xff] }
  0xde   :  { %v763_v41 = vmul.f32 0.01, %v635_v19  ;;  %v794_v11 = vmul.f32 0.01, %v666_v6  ;;  %v795_v39 = vmul.f32 0.01, %v667_v43  ;;  %v826_v52 = vsel %vm698_vm2, %v634_v54, %v762_v27 }
  0xdf   :  { %v509_v50 = vadd.f32 %v4298_v51, %v4297_v33  ;;  %v3693_v28 = vadd.f32 %v1140_v0, %v1139_v42  ;;  %v540_v15 = vadd.f32 %v4300_v2, %v4299_v8  ;;  %v541_v35 = vadd.f32 %v4302_v47, %v4301_v16  ;;  %v4304_v54 = vld [vmem:[#allocation69_spill] sm:$0xff]  ;;  %v4307_v0 = vld [vmem:[#allocation30_spill] sm:$0xff]  ;;  %v4308_v27 = vld [vmem:[#allocation71_spill] sm:$0xff] }
  0xe0   :  { %v827_v55 = vsel %vm699_vm3, %v635_v19, %v763_v41  ;;  %v858_v29 = vsel %vm730_vm5, %v666_v6, %v794_v11  ;;  %v859_v1 = vsel %vm731_vm6, %v667_v43, %v795_v39  ;;  %v3700_v17 = vmul.f32 %v826_v52, %v3533_v4  ;;  %v4305_v19 = vld [vmem:[#allocation29_spill] sm:$0xff]  ;;  %v4309_v11 = vld [vmem:[#allocation31_spill] sm:$0xff]  ;;  %v4310_v39 = vld [vmem:[#allocation72_spill] sm:$0xff] }
  0xe1   :  { %v597_v36 = vstv %s2738_s2  ;;  %v3703_v23 = vmul.f32 %v827_v55, %v3539_v40  ;;  %v922_v37 = vmul.f32 %v858_v29, %v3541_v9  ;;  %v923_v45 = vmul.f32 %v859_v1, %v3543_v62  ;;  %v4311_v55 = vld [vmem:[#allocation32_spill] sm:$0xff]  ;;  %v4312_v8 = vld [vmem:[#allocation73_spill] sm:$0xff] }
  0xe2   :  { %v636_v5 = vadd.f32 %v597_v36, %v508_v58  ;;  %v637_v10 = vadd.f32 %v597_v36, %v509_v50  ;;  %v668_v63 = vadd.f32 %v597_v36, %v540_v15  ;;  %v669_v30 = vadd.f32 %v597_v36, %v541_v35 }
  0xe3   :  { %v510_v24 = vadd.f32 %v4304_v54, %v4303_v31  ;;  %v3710_v61 = vsel %vm940_vm4, %v922_v37, 0.0  ;;  %v511_v60 = vadd.f32 %v4306_v26, %v4305_v19  ;;  %v542_v41 = vadd.f32 %v4308_v27, %v4307_v0 }
  0xe4   :  { %vm700_vm7 = vcmp.ge.f32.partialorder %v636_v5, 0.0  ;;  %vm701_vm8 = vcmp.ge.f32.partialorder %v637_v10, 0.0  ;;  %vm732_vm9 = vcmp.ge.f32.partialorder %v668_v63, 0.0  ;;  %vm733_vm10 = vcmp.ge.f32.partialorder %v669_v30, 0.0 }
  0xe5   :  { %v764_v58 = vmul.f32 0.01, %v636_v5  ;;  %v765_v6 = vmul.f32 0.01, %v637_v10  ;;  %v796_v43 = vmul.f32 0.01, %v668_v63  ;;  %v543_v52 = vadd.f32 %v4310_v39, %v4309_v11 }
  0xe6   :  { %v797_v42 = vmul.f32 0.01, %v669_v30  ;;  %v600_v50 = vstv %s2740_s29  ;;  %v512_v2 = vadd.f32 %v4312_v8, %v4311_v55  ;;  %v4315_v11 = vld [vmem:[#allocation34_spill] sm:$0xff]  ;;  %v4316_v39 = vld [vmem:[#allocation75_spill] sm:$0xff]  ;;  %v4318_v8 = vld [vmem:[#allocation76_spill] sm:$0xff] }
  0xe7   :  { %v828_v33 = vsel %vm700_vm7, %v636_v5, %v764_v58  ;;  %v829_v51 = vsel %vm701_vm8, %v637_v10, %v765_v6  ;;  %v860_v15 = vsel %vm732_vm9, %v668_v63, %v796_v43  ;;  %v638_v36 = vadd.f32 %v600_v50, %v510_v24  ;;  %v4314_v43 = vld [vmem:[#allocation74_spill] sm:$0xff]  ;;  %v4317_v55 = vld [vmem:[#allocation35_spill] sm:$0xff] }
  0xe8   :  { %v861_v16 = vsel %vm733_vm10, %v669_v30, %v797_v42  ;;  %v892_v47 = vmul.f32 %v828_v33, %v3533_v4  ;;  %v893_v35 = vmul.f32 %v829_v51, %v3539_v40  ;;  %v924_v29 = vmul.f32 %v860_v15, %v3541_v9 }
  0xe9   :  { %v925_v1 = vmul.f32 %v861_v16, %v3543_v62  ;;  %v639_v37 = vadd.f32 %v600_v50, %v511_v60  ;;  %v670_v10 = vadd.f32 %v600_v50, %v542_v41  ;;  %v671_v54 = vadd.f32 %v600_v50, %v543_v52  ;;  %v4313_v60 = vld [vmem:[#allocation33_spill] sm:$0xff] }
  0xea   :  { %v1013_v31 = vsel %vm940_vm4, %v892_v47, 0.0  ;;  %v1014_v5 = vsel %vm940_vm4, %v893_v35, 0.0  ;;  %v1157_v63 = vsel %vm940_vm4, %v924_v29, 0.0  ;;  %vm702_vm11 = vcmp.ge.f32.partialorder %v638_v36, 0.0 }
  0xeb   :  { %v1015_v19 = vadd.f32 %v1014_v5, %v1013_v31  ;;  %v1158_v30 = vsel %vm940_vm4, %v925_v1, 0.0  ;;  %vm703_vm12 = vcmp.ge.f32.partialorder %v639_v37, 0.0  ;;  %vm734_vm13 = vcmp.ge.f32.partialorder %v670_v10, 0.0 }
  0xec   :  { %v1159_v26 = vadd.f32 %v1158_v30, %v1157_v63  ;;  %vm735_vm14 = vcmp.ge.f32.partialorder %v671_v54, 0.0  ;;  %v766_v6 = vmul.f32 0.01, %v638_v36  ;;  %v767_v24 = vmul.f32 0.01, %v639_v37 }
  0xed   :  { %v1016_v58 = vrot.slane %v1015_v19, 4  ;;  %v513_v42 = vadd.f32 %v4314_v43, %v4313_v60  ;;  %v798_v27 = vmul.f32 0.01, %v670_v10  ;;  %v799_v41 = vmul.f32 0.01, %v671_v54 }
  0xee   :  { %v1160_v0 = vrot.slane %v1159_v26, 4  ;;  %v544_v52 = vadd.f32 %v4316_v39, %v4315_v11  ;;  %v830_v51 = vsel %vm702_vm11, %v638_v36, %v766_v6  ;;  %v831_v50 = vsel %vm703_vm12, %v639_v37, %v767_v24  ;;  %v4320_v11 = vld [vmem:[#allocation77_spill] sm:$0xff] }
  0xef   :  { %v1017_v33 = vadd.f32 %v1016_v58, %v1015_v19  ;;  %v545_v15 = vadd.f32 %v4318_v8, %v4317_v55  ;;  %v862_v47 = vsel %vm734_vm13, %v670_v10, %v798_v27  ;;  %v863_v35 = vsel %vm735_vm14, %v671_v54, %v799_v41  ;;  %v4319_v41 = vld [vmem:[#allocation36_spill] sm:$0xff] }
  0xf0   :  { %v1161_v16 = vadd.f32 %v1160_v0, %v1159_v26  ;;  %v894_v29 = vmul.f32 %v830_v51, %v3533_v4  ;;  %v895_v31 = vmul.f32 %v831_v50, %v3539_v40  ;;  %v926_v5 = vmul.f32 %v862_v47, %v3541_v9 }
  0xf1   :  { %v1018_v1 = vrot.slane %v1017_v33, 2  ;;  %v927_v19 = vmul.f32 %v863_v35, %v3543_v62  ;;  %v3741_v36 = vsel %vm940_vm4, %v923_v45, 0.0  ;;  %v603_v30 = vstv %s2742_s30 }
  0xf2   :  { %v1162_v37 = vrot.slane %v1161_v16, 2  ;;  %v1022_v63 = vsel %vm940_vm4, %v894_v29, 0.0  ;;  %v1023_v10 = vsel %vm940_vm4, %v895_v31, 0.0  ;;  %v1166_v54 = vsel %vm940_vm4, %v926_v5, 0.0  ;;  %v4322_v29 = vld [vmem:[#allocation78_spill] sm:$0xff] }
  0xf3   :  { %v3744_v26 = vadd.f32 %v1018_v1, %v1017_v33  ;;  %v1167_v58 = vsel %vm940_vm4, %v927_v19, 0.0  ;;  %v1024_v24 = vadd.f32 %v1023_v10, %v1022_v63  ;;  %v640_v43 = vadd.f32 %v603_v30, %v512_v2 }
  0xf4   :  { %v1163_v6 = vadd.f32 %v1162_v37, %v1161_v16  ;;  %v1168_v60 = vadd.f32 %v1167_v58, %v1166_v54  ;;  %v641_v0 = vadd.f32 %v603_v30, %v513_v42  ;;  %v672_v27 = vadd.f32 %v603_v30, %v544_v52  ;;  %v4323_v54 = vld [vmem:[#allocation38_spill] sm:$0xff]  ;;  %v4324_v58 = vld [vmem:[#allocation79_spill] sm:$0xff] }
  0xf5   :  { %v673_v45 = vadd.f32 %v603_v30, %v545_v15  ;;  %v514_v39 = vadd.f32 %v4320_v11, %v4319_v41  ;;  %v1025_v33 = vrot.slane %v1024_v24, 4  ;;  %vm704_vm15 = vcmp.ge.f32.partialorder %v640_v43, 0.0  ;;  %v4321_v15 = vld [vmem:[#allocation37_spill] sm:$0xff] }
  0xf6   :  { %v1169_v50 = vrot.slane %v1168_v60, 4  ;;  %v1164_v55 = vrot.slane %v1163_v6, 1  ;;  %vm705_vm0 = vcmp.ge.f32.partialorder %v641_v0, 0.0  ;;  %vm736_vm1 = vcmp.ge.f32.partialorder %v672_v27, 0.0 }
  0xf7   :  { %v768_v8 = vmul.f32 0.01, %v640_v43  ;;  %v1026_v47 = vadd.f32 %v1025_v33, %v1024_v24  ;;  %vm737_vm2 = vcmp.ge.f32.partialorder %v673_v45, 0.0  ;;  %v769_v35 = vmul.f32 0.01, %v641_v0 }
  0xf8   :  { %v1170_v16 = vadd.f32 %v1169_v50, %v1168_v60  ;;  %v800_v2 = vmul.f32 0.01, %v672_v27  ;;  %v801_v42 = vmul.f32 0.01, %v673_v45  ;;  %v515_v1 = vadd.f32 %v4322_v29, %v4321_v15  ;;  %v4325_v50 = vld [vmem:[#allocation39_spill] sm:$0xff] }
  0xf9   :  { %v832_v52 = vsel %vm704_vm15, %v640_v43, %v768_v8  ;;  %v1027_v31 = vrot.slane %v1026_v47, 2  ;;  %v833_v19 = vsel %vm705_vm0, %v641_v0, %v769_v35  ;;  %v546_v24 = vadd.f32 %v4324_v58, %v4323_v54  ;;  %v4326_v8 = vld [vmem:[#allocation80_spill] sm:$0xff] }
  0xfa   :  { %v1171_v5 = vrot.slane %v1170_v16, 2  ;;  %v896_v37 = vmul.f32 %v832_v52, %v3533_v4  ;;  %v864_v63 = vsel %vm736_vm1, %v672_v27, %v800_v2  ;;  %v865_v30 = vsel %vm737_vm2, %v673_v45, %v801_v42 }
  0xfb   :  { %v897_v10 = vmul.f32 %v833_v19, %v3539_v40  ;;  %v3758_v60 = vadd.f32 %v1027_v31, %v1026_v47  ;;  %v928_v43 = vmul.f32 %v864_v63, %v3541_v9  ;;  %v929_v11 = vmul.f32 %v865_v30, %v3543_v62 }
  0xfc   :  { %v1172_v41 = vadd.f32 %v1171_v5, %v1170_v16  ;;  %v1031_v33 = vsel %vm940_vm4, %v896_v37, 0.0  ;;  %v547_v27 = vadd.f32 %v4326_v8, %v4325_v50  ;;  %v606_v45 = vstv %s2744_s3 }
  0xfd   :  { %v1032_v0 = vsel %vm940_vm4, %v897_v10, 0.0  ;;  %v3766_v35 = vadd.f32 %v1164_v55, %v1163_v6  ;;  %v1175_v47 = vsel %vm940_vm4, %v928_v43, 0.0  ;;  %v1176_v16 = vsel %vm940_vm4, %v929_v11, 0.0  ;;  %v4327_v11 = vld [vmem:[#allocation40_spill] sm:$0xff] }
  0xfe   :  { %v1173_v2 = vrot.slane %v1172_v41, 1  ;;  %v1033_v42 = vadd.f32 %v1032_v0, %v1031_v33  ;;  %v642_v52 = vadd.f32 %v606_v45, %v514_v39  ;;  %v643_v15 = vadd.f32 %v606_v45, %v515_v1  ;;  %v4328_v33 = vld [vmem:[#allocation81_spill] sm:$0xff] }
  0xff   :  { %v674_v29 = vadd.f32 %v606_v45, %v546_v24  ;;  %v1177_v19 = vadd.f32 %v1176_v16, %v1175_v47  ;;  %v675_v37 = vadd.f32 %v606_v45, %v547_v27  ;;  %v516_v0 = vadd.f32 %v4328_v33, %v4327_v11  ;;  %v4330_v16 = vld [vmem:[#allocation82_spill] sm:$0xff] }
 0x100   :  { %v1034_v5 = vrot.slane %v1033_v42, 4  ;;  %vm706_vm3 = vcmp.ge.f32.partialorder %v642_v52, 0.0  ;;  %vm707_vm5 = vcmp.ge.f32.partialorder %v643_v15, 0.0  ;;  %v770_v63 = vmul.f32 0.01, %v642_v52 }
 0x101   :  { %vm738_vm6 = vcmp.ge.f32.partialorder %v674_v29, 0.0  ;;  %v1178_v55 = vrot.slane %v1177_v19, 4  ;;  %vm739_vm7 = vcmp.ge.f32.partialorder %v675_v37, 0.0  ;;  %v771_v30 = vmul.f32 0.01, %v643_v15 }
 0x102   :  { %v1035_v6 = vadd.f32 %v1034_v5, %v1033_v42  ;;  %v3771_v10 = vadd.f32 %v1173_v2, %v1172_v41  ;;  %v802_v54 = vmul.f32 0.01, %v674_v29  ;;  %v803_v58 = vmul.f32 0.01, %v675_v37  ;;  %v4329_v2 = vld [vmem:[#allocation41_spill] sm:$0xff] }
 0x103   :  { %v834_v39 = vsel %vm706_vm3, %v642_v52, %v770_v63  ;;  %v1179_v1 = vadd.f32 %v1178_v55, %v1177_v19  ;;  %v835_v24 = vsel %vm707_vm5, %v643_v15, %v771_v30  ;;  %v517_v52 = vadd.f32 %v4330_v16, %v4329_v2  ;;  %v4331_v19 = vld [vmem:[#allocation42_spill] sm:$0xff]  ;;  %v4332_v63 = vld [vmem:[#allocation83_spill] sm:$0xff] }
 0x104   :  { %v898_v43 = vmul.f32 %v834_v39, %v3533_v4  ;;  %v1036_v50 = vrot.slane %v1035_v6, 2  ;;  %v866_v8 = vsel %vm738_vm6, %v674_v29, %v802_v54  ;;  %v867_v27 = vsel %vm739_vm7, %v675_v37, %v803_v58  ;;  %v4333_v29 = vld [vmem:[#allocation43_spill] sm:$0xff]  ;;  %v4334_v37 = vld [vmem:[#allocation84_spill] sm:$0xff] }
 0x105   :  { %v899_v45 = vmul.f32 %v835_v24, %v3539_v40  ;;  %v1180_v42 = vrot.slane %v1179_v1, 2  ;;  %v930_v47 = vmul.f32 %v866_v8, %v3541_v9  ;;  %v931_v41 = vmul.f32 %v867_v27, %v3543_v62  ;;  %v4335_v27 = vld [vmem:[#allocation44_spill] sm:$0xff] }
 0x106   :  { %v1040_v15 = vsel %vm940_vm4, %v898_v43, 0.0  ;;  %v548_v55 = vadd.f32 %v4332_v63, %v4331_v19  ;;  %v549_v30 = vadd.f32 %v4334_v37, %v4333_v29  ;;  %v3789_v11 = vadd.f32 %v1036_v50, %v1035_v6  ;;  %v4336_v43 = vld [vmem:[#allocation85_spill] sm:$0xff]  ;;  %v4339_v6 = vld [vmem:[#allocation46_spill] sm:$0xff]  ;;  %v4340_v50 = vld [vmem:[#allocation87_spill] sm:$0xff] }
 0x107   :  { %v1041_v5 = vsel %vm940_vm4, %v899_v45, 0.0  ;;  %v1181_v54 = vadd.f32 %v1180_v42, %v1179_v1  ;;  %v1184_v39 = vsel %vm940_vm4, %v930_v47, 0.0  ;;  %v1185_v24 = vsel %vm940_vm4, %v931_v41, 0.0  ;;  %v4337_v1 = vld [vmem:[#allocation45_spill] sm:$0xff]  ;;  %v4338_v42 = vld [vmem:[#allocation86_spill] sm:$0xff] }
 0x108   :  { %v1042_v58 = vadd.f32 %v1041_v5, %v1040_v15  ;;  %v1186_v33 = vadd.f32 %v1185_v24, %v1184_v39  ;;  %v609_v8 = vstv %s2746_s7  ;;  %v518_v2 = vadd.f32 %v4336_v43, %v4335_v27 }
 0x109   :  { %v1182_v45 = vrot.slane %v1181_v54, 1  ;;  %v644_v31 = vadd.f32 %v609_v8, %v516_v0  ;;  %v645_v19 = vadd.f32 %v609_v8, %v517_v52  ;;  %v676_v51 = vadd.f32 %v609_v8, %v548_v55 }
 0x10a   :  { %v1043_v16 = vrot.slane %v1042_v58, 4  ;;  %v1187_v63 = vrot.slane %v1186_v33, 4  ;;  %v677_v29 = vadd.f32 %v609_v8, %v549_v30  ;;  %v519_v15 = vadd.f32 %v4338_v42, %v4337_v1  ;;  %v4342_v8 = vld [vmem:[#allocation88_spill] sm:$0xff] }
 0x10b   :  { %v3795_v47 = vadd.f32 %v1182_v45, %v1181_v54  ;;  %vm708_vm8 = vcmp.ge.f32.partialorder %v644_v31, 0.0  ;;  %v550_v5 = vadd.f32 %v4340_v50, %v4339_v6  ;;  %vm709_vm9 = vcmp.ge.f32.partialorder %v645_v19, 0.0  ;;  %v4341_v54 = vld [vmem:[#allocation47_spill] sm:$0xff] }
 0x10c   :  { %v3797_v41 = vadd.f32 %v1043_v16, %v1042_v58  ;;  %v1188_v37 = vadd.f32 %v1187_v63, %v1186_v33  ;;  %vm740_vm10 = vcmp.ge.f32.partialorder %v676_v51, 0.0  ;;  %v772_v0 = vmul.f32 0.01, %v644_v31 }
 0x10d   :  { %vm741_vm11 = vcmp.ge.f32.partialorder %v677_v29, 0.0  ;;  %v773_v55 = vmul.f32 0.01, %v645_v19  ;;  %v804_v30 = vmul.f32 0.01, %v676_v51  ;;  %v551_v58 = vadd.f32 %v4342_v8, %v4341_v54  ;;  %v4343_v8 = vld [vmem:[#allocation48_spill] sm:$0xff] }
 0x10e   :  { %v805_v39 = vmul.f32 0.01, %v677_v29  ;;  %v836_v24 = vsel %vm708_vm8, %v644_v31, %v772_v0  ;;  %v612_v27 = vstv %s2748_s8  ;;  %v1189_v33 = vrot.slane %v1188_v37, 2 }
 0x10f   :  { %v837_v43 = vsel %vm709_vm9, %v645_v19, %v773_v55  ;;  %v868_v45 = vsel %vm740_vm10, %v676_v51, %v804_v30  ;;  %v900_v16 = vmul.f32 %v836_v24, %v3533_v4  ;;  %v646_v1 = vadd.f32 %v612_v27, %v518_v2 }
 0x110   :  { %v869_v63 = vsel %vm741_vm11, %v677_v29, %v805_v39  ;;  %v901_v42 = vmul.f32 %v837_v43, %v3539_v40  ;;  %v932_v6 = vmul.f32 %v868_v45, %v3541_v9  ;;  %v647_v31 = vadd.f32 %v612_v27, %v519_v15  ;;  %v3816_v45 = vld [vmem:[#allocation4] sm:$0xff] }
 0x111   :  { %v933_v50 = vmul.f32 %v869_v63, %v3543_v62  ;;  %v1049_v52 = vsel %vm940_vm4, %v900_v16, 0.0  ;;  %v678_v0 = vadd.f32 %v612_v27, %v550_v5  ;;  %v679_v51 = vadd.f32 %v612_v27, %v551_v58  ;;  %v4344_v58 = vld [vmem:[#allocation89_spill] sm:$0xff] }
 0x112   :  { %v1050_v54 = vsel %vm940_vm4, %v901_v42, 0.0  ;;  %v1193_v19 = vsel %vm940_vm4, %v932_v6, 0.0  ;;  %vm710_vm12 = vcmp.ge.f32.partialorder %v646_v1, 0.0  ;;  %vm711_vm13 = vcmp.ge.f32.partialorder %v647_v31, 0.0  ;;  %v4345_v63 = vld [vmem:[#allocation49_spill] sm:$0xff]  ;;  %v4346_v42 = vld [vmem:[#allocation90_spill] sm:$0xff] }
 0x113   :  { %v1051_v4 = vadd.f32 %v1050_v54, %v1049_v52  ;;  %v1194_v2 = vsel %vm940_vm4, %v933_v50, 0.0  ;;  %vm742_vm14 = vcmp.ge.f32.partialorder %v678_v0, 0.0  ;;  %vm743_vm15 = vcmp.ge.f32.partialorder %v679_v51, 0.0  ;;  %v3823_v6 = vld [vmem:[#allocation4 + $0x8] sm:$0xff]  ;;  %v3826_v50 = vld [vmem:[#allocation4 + $0x10] sm:$0xff]  ;;  %v3829_v54 = vld [vmem:[#allocation4 + $0x18] sm:$0xff] }
 0x114   :  { %v1195_v40 = vadd.f32 %v1194_v2, %v1193_v19  ;;  %v774_v9 = vmul.f32 0.01, %v646_v1  ;;  %v775_v29 = vmul.f32 0.01, %v647_v31  ;;  %v3812_v62 = vadd.f32 %v1189_v33, %v1188_v37  ;;  %v4348_v2 = vld [vmem:[#allocation91_spill] sm:$0xff] }
 0x115   :  { %v1052_v55 = vrot.slane %v1051_v4, 4  ;;  %v806_v15 = vmul.f32 0.01, %v678_v0  ;;  %v807_v5 = vmul.f32 0.01, %v679_v51  ;;  %v520_v27 = vadd.f32 %v4344_v58, %v4343_v8 }
 0x116   :  { %v1196_v30 = vrot.slane %v1195_v40, 4  ;;  %v838_v39 = vsel %vm710_vm12, %v646_v1, %v774_v9  ;;  %v839_v24 = vsel %vm711_vm13, %v647_v31, %v775_v29  ;;  %v521_v37 = vadd.f32 %v4346_v42, %v4345_v63  ;;  %v4349_v29 = vld [vmem:[#allocation51_spill] sm:$0xff] }
 0x117   :  { %v870_v52 = vsel %vm742_vm14, %v678_v0, %v806_v15  ;;  %v871_v43 = vsel %vm743_vm15, %v679_v51, %v807_v5  ;;  %v902_v16 = vmul.f32 %v3816_v45, %v838_v39  ;;  %v903_v1 = vmul.f32 %v3823_v6, %v839_v24  ;;  %v4347_v51 = vld [vmem:[#allocation50_spill] sm:$0xff] }
 0x118   :  { %v3821_v33 = vadd.f32 %v1196_v30, %v1195_v40  ;;  %v934_v31 = vmul.f32 %v3826_v50, %v870_v52  ;;  %v935_v0 = vmul.f32 %v3829_v54, %v871_v43  ;;  %v552_v9 = vadd.f32 %v4348_v2, %v4347_v51  ;;  %v4350_v40 = vld [vmem:[#allocation92_spill] sm:$0xff] }
 0x119   :  { %v1058_v19 = vsel %vm940_vm4, %v902_v16, 0.0  ;;  %v553_v15 = vadd.f32 %v4350_v40, %v4349_v29  ;;  %v615_v5 = vstv %s2750_s9  ;;  %v3837_v30 = vadd.f32 %v1052_v55, %v1051_v4  ;;  %v4351_v2 = vld [vmem:[#allocation52_spill] sm:$0xff]  ;;  %v4352_v29 = vld [vmem:[#allocation93_spill] sm:$0xff] }
 0x11a   :  { %v1059_v39 = vsel %vm940_vm4, %v903_v1, 0.0  ;;  %v1202_v24 = vsel %vm940_vm4, %v934_v31, 0.0  ;;  %v1203_v8 = vsel %vm940_vm4, %v935_v0, 0.0  ;;  %v648_v43 = vadd.f32 %v615_v5, %v520_v27  ;;  %v4353_v55 = vld [vmem:[#allocation53_spill] sm:$0xff]  ;;  %v4354_v1 = vld [vmem:[#allocation94_spill] sm:$0xff] }
 0x11b   :  { %v3842_v58 = vadd.f32 %v1059_v39, %v1058_v19  ;;  %v1204_v52 = vadd.f32 %v1203_v8, %v1202_v24  ;;  %v649_v16 = vadd.f32 %v615_v5, %v521_v37  ;;  %v680_v42 = vadd.f32 %v615_v5, %v552_v9 }
 0x11c   :  { %v681_v51 = vadd.f32 %v615_v5, %v553_v15  ;;  %v522_v40 = vadd.f32 %v4352_v29, %v4351_v2  ;;  %vm712_vm0 = vcmp.ge.f32.partialorder %v648_v43, 0.0  ;;  %v523_v31 = vadd.f32 %v4354_v1, %v4353_v55  ;;  %v4355_v15 = vld [vmem:[#allocation54_spill] sm:$0xff]  ;;  %v4356_v5 = vld [vmem:[#allocation95_spill] sm:$0xff] }
 0x11d   :  { %vm713_vm1 = vcmp.ge.f32.partialorder %v649_v16, 0.0  ;;  %vm744_vm2 = vcmp.ge.f32.partialorder %v680_v42, 0.0  ;;  %v776_v27 = vmul.f32 0.01, %v648_v43  ;;  %v777_v37 = vmul.f32 0.01, %v649_v16 }
 0x11e   :  { %vm745_vm3 = vcmp.ge.f32.partialorder %v681_v51, 0.0  ;;  %v1205_v0 = vrot.slane %v1204_v52, 4  ;;  %v808_v19 = vmul.f32 0.01, %v680_v42  ;;  %v809_v9 = vmul.f32 0.01, %v681_v51 }
 0x11f   :  { %v554_v39 = vadd.f32 %v4356_v5, %v4355_v15  ;;  %v840_v24 = vsel %vm712_vm0, %v648_v43, %v776_v27  ;;  %v841_v8 = vsel %vm713_vm1, %v649_v16, %v777_v37  ;;  %v4357_v2 = vld [vmem:[#allocation55_spill] sm:$0xff]  ;;  %v618_v63 = vstv %s2752_s10 }
 0x120   :  { %v555_v29 = vadd.f32 %v3576_v46, %v4357_v2  ;;  %v872_v55 = vsel %vm744_vm2, %v680_v42, %v808_v19  ;;  %v873_v1 = vsel %vm745_vm3, %v681_v51, %v809_v9  ;;  %v904_v4 = vmul.f32 %v3816_v45, %v840_v24 }
 0x121   :  { %v905_v44 = vmul.f32 %v3823_v6, %v841_v8  ;;  %v936_v38 = vmul.f32 %v3826_v50, %v872_v55  ;;  %v937_v57 = vmul.f32 %v3829_v54, %v873_v1  ;;  %v650_v32 = vadd.f32 %v618_v63, %v522_v40 }
 0x122   :  { %v651_v21 = vadd.f32 %v618_v63, %v523_v31  ;;  %v3860_v15 = vadd.f32 %v1205_v0, %v1204_v52  ;;  %v1067_v43 = vsel %vm940_vm4, %v904_v4, 0.0  ;;  %v682_v16 = vadd.f32 %v618_v63, %v554_v39 }
 0x123   :  { %v683_v46 = vadd.f32 %v618_v63, %v555_v29  ;;  %v1068_v42 = vsel %vm940_vm4, %v905_v44, 0.0  ;;  %v1211_v51 = vsel %vm940_vm4, %v936_v38, 0.0  ;;  %v1212_v27 = vsel %vm940_vm4, %v937_v57, 0.0  ;;  %v4358_v63 = vld [vmem:[#allocation14_spill] sm:$0xff]  ;;  %v4359_v44 = vld [vmem:[#allocation15_spill] sm:$0xff] }
 0x124   :  { %vm714_vm5 = vcmp.ge.f32.partialorder %v650_v32, 0.0  ;;  %v3866_v37 = vadd.f32 %v1212_v27, %v1211_v51  ;;  %vm715_vm6 = vcmp.ge.f32.partialorder %v651_v21, 0.0  ;;  %vm746_vm7 = vcmp.ge.f32.partialorder %v682_v16, 0.0 }
 0x125   :  { %vm747_vm8 = vcmp.ge.f32.partialorder %v683_v46, 0.0  ;;  %v778_v40 = vmul.f32 0.01, %v650_v32  ;;  %v779_v31 = vmul.f32 0.01, %v651_v21  ;;  %v61_v0 = vstv %s3850_s13 }
 0x126   :  { %v810_v52 = vmul.f32 0.01, %v682_v16  ;;  %v3869_v19 = vadd.f32 %v1068_v42, %v1067_v43  ;;  %v811_v4 = vmul.f32 0.01, %v683_v46  ;;  %vm73_vm9 = vcmp.lt.s32.totalorder %v4358_v63, %v61_v0 }
 0x127   :  { %vm74_vm10 = vcmp.lt.s32.totalorder %v4359_v44, %v61_v0  ;;  %v842_v38 = vsel %vm714_vm5, %v650_v32, %v778_v40  ;;  %v843_v9 = vsel %vm715_vm6, %v651_v21, %v779_v31  ;;  %v4360_v5 = vmov 0.0  }
 0x128   :  { %v874_v57 = vsel %vm746_vm7, %v682_v16, %v810_v52  ;;  %v2411_v39 = vsel %vm73_vm9, 1.0, %v4360_v5  ;;  %v875_v24 = vsel %vm747_vm8, %v683_v46, %v811_v4  ;;  %v906_v8 = vmul.f32 %v3816_v45, %v842_v38 }
 0x129   :  { %v907_v2 = vmul.f32 %v3823_v6, %v843_v9  ;;  %v938_v29 = vmul.f32 %v3826_v50, %v874_v57  ;;  %v1214_v55 = vrot.slane %v3866_v37, 4  ;;  %v939_v1 = vmul.f32 %v3829_v54, %v875_v24  ;;  %v3910_v9 = vpop.f32.mrb[0].mxu0 }
 0x12a   :  { %v2412_v43 = vsel %vm74_vm10, 1.0, %v4360_v5  ;;  %v949_v21 = vadd.f32 %v948_v18, %v3571_v49  ;;  %v3884_v32 = vsel %vm940_vm4, %v906_v8, 0.0  ;;  %v4361_v42 = vrot.slane %v3581_v56, 1 }
 0x12b   :  { %v3887_v16 = vsel %vm940_vm4, %v907_v2, 0.0  ;;  %v2767_v46 = vpack.i.bf16 %v2412_v43, %v2411_v39  ;;  %v3893_v27 = vsel %vm940_vm4, %v938_v29, 0.0  ;;  %v966_v40 = vrot.slane %v3619_v25, 1 }
 0x12c   :  { %v958_v51 = vadd.f32 %v4361_v42, %v3581_v56  ;;  %v4362_v31 = vrot.slane %v3622_v53, 2  ;;  %v4363_v18 = vrot.slane %v3639_v12, 4  ;;  %v3903_v0 = vsel %vm940_vm4, %v939_v1, 0.0 }
 0x12d   :  { %2768 = vperm.xlu0 %2761, %v2767_v46   ;;  %v989_v4 = vrot.slane %v3672_v14, 4  ;;  %v997_v56 = vadd.f32 %v3689_v59, %v3684_v22  ;;  %v1004_v38 = vsel %vm940_vm4, %v3700_v17, 0.0  ;;  %vm1261_vm11 = vcmask 1041409  }
 0x12e   :  { %v974_v49 = vadd.f32 %v4362_v31, %v3622_v53  ;;  %v981_v52 = vadd.f32 %v4363_v18, %v3639_v12  ;;  %v967_v53 = vadd.f32 %v966_v40, %v3619_v25  ;;  %v1005_v12 = vsel %vm940_vm4, %v3703_v23, 0.0 }
 0x12f   :  { %v990_v39 = vadd.f32 %v989_v4, %v3672_v14  ;;  %v998_v24 = vrot.slane %v997_v56, 4  ;;  %v1006_v8 = vadd.f32 %v1005_v12, %v1004_v38  ;;  %v1262_v22 = vsel %vm1261_vm11, %v958_v51, %v949_v21 }
 0x130   :  { %v975_v57 = vrot.slane %v974_v49, 1  ;;  %v982_v5 = vrot.slane %v981_v52, 2  ;;  %vm1263_vm12 = vcmask 1042434   ;;  %vm1265_vm13 = vcmask 1043459  }
 0x131   :  { %v991_v59 = vrot.slane %v990_v39, 2  ;;  %v999_v17 = vadd.f32 %v998_v24, %v997_v56  ;;  %v1007_v1 = vrot.slane %v1006_v8, 4  ;;  %v1264_v25 = vsel %vm1263_vm12, %v967_v53, %v1262_v22 }
 0x132   :  { %v976_v2 = vadd.f32 %v975_v57, %v974_v49  ;;  %v983_v29 = vadd.f32 %v982_v5, %v981_v52  ;;  %vm1267_vm14 = vcmask 1044484   ;;  %vm1269_vm15 = vcmask 1045509  }
 0x133   :  { %v992_v23 = vadd.f32 %v991_v59, %v990_v39  ;;  %v1000_v46 = vrot.slane %v999_v17, 2  ;;  %v1008_v14 = vadd.f32 %v1007_v1, %v1006_v8  ;;  %vm1271_vm0 = vcmask 1046534  }
 0x134   :  { %v984_v43 = vrot.slane %v983_v29, 1  ;;  %v1266_v42 = vsel %vm1265_vm13, %v976_v2, %v1264_v25  ;;  %vm1273_vm1 = vcmask 1047559   ;;  %v4364_v21 = vrot.slane %v3610_v3, 1 }
 0x135   :  { %v993_v31 = vrot.slane %v992_v23, 1  ;;  %v1001_v49 = vadd.f32 %v1000_v46, %v999_v17  ;;  %v1009_v18 = vrot.slane %v1008_v14, 2  ;;  %v1119_v52 = vrot.slane %v3643_v34, 1 }
 0x136   :  { %v985_v40 = vadd.f32 %v984_v43, %v983_v29  ;;  %v1111_v51 = vadd.f32 %v4364_v21, %v3610_v3  ;;  %v1126_v56 = vrot.slane %v3646_v48, 2  ;;  %v4365_v38 = vrot.slane %v3668_v13, 4 }
 0x137   :  { %v1142_v57 = vrot.slane %v3693_v28, 4  ;;  %v994_v5 = vadd.f32 %v993_v31, %v992_v23  ;;  %v1002_v12 = vrot.slane %v1001_v49, 1  ;;  %v1010_v39 = vadd.f32 %v1009_v18, %v1008_v14 }
 0x138   :  { %v1268_v4 = vsel %vm1267_vm14, %v985_v40, %v1266_v42  ;;  %v1134_v53 = vadd.f32 %v4365_v38, %v3668_v13  ;;  %v1120_v3 = vadd.f32 %v1119_v52, %v3643_v34  ;;  %v1127_v24 = vadd.f32 %v1126_v56, %v3646_v48 }
 0x139   :  { %v1143_v2 = vadd.f32 %v1142_v57, %v3693_v28  ;;  %v1150_v29 = vadd.f32 %v3741_v36, %v3710_v61  ;;  %v1003_v22 = vadd.f32 %v1002_v12, %v1001_v49  ;;  %v1011_v59 = vrot.slane %v1010_v39, 1 }
 0x13a   :  { %v1135_v8 = vrot.slane %v1134_v53, 2  ;;  %v1270_v17 = vsel %vm1269_vm15, %v994_v5, %v1268_v4  ;;  %v1282_v13 = vsel %vm1261_vm11, %v3605_v20, %v3591_v7  ;;  %v1128_v1 = vrot.slane %v1127_v24, 1 }
 0x13b   :  { %v1144_v43 = vrot.slane %v1143_v2, 2  ;;  %v1151_v34 = vrot.slane %v1150_v29, 4  ;;  %v1012_v23 = vadd.f32 %v1011_v59, %v1010_v39  ;;  %v1272_v48 = vsel %vm1271_vm0, %v1003_v22, %v1270_v17 }
 0x13c   :  { %v1136_v25 = vadd.f32 %v1135_v8, %v1134_v53  ;;  %v1283_v28 = vsel %vm1263_vm12, %v1111_v51, %v1282_v13  ;;  %v4366_v61 = vrot.slane %v3744_v26, 1  ;;  %v1129_v46 = vadd.f32 %v1128_v1, %v1127_v24 }
 0x13d   :  { %v1145_v42 = vadd.f32 %v1144_v43, %v1143_v2  ;;  %v1152_v40 = vadd.f32 %v1151_v34, %v1150_v29  ;;  %v1274_v21 = vsel %vm1273_vm1, %v1012_v23, %v1272_v48  ;;  %v1284_v7 = vsel %vm1265_vm13, %v1120_v3, %v1283_v28 }
 0x13e   :  { %v1021_v36 = vadd.f32 %v4366_v61, %v3744_v26  ;;  %v1137_v14 = vrot.slane %v1136_v25, 1  ;;  %v4367_v20 = vrot.slane %v3758_v60, 1  ;;  %v1038_v49 = vrot.slane %v3789_v11, 1  ;;  %1300 = vxpose.xlu1.b32.start [1/2] (short) (narrow) %v1274_v21, 16 }
 0x13f   :  { %v1146_v18 = vrot.slane %v1145_v42, 1  ;;  %v1153_v52 = vrot.slane %v1152_v40, 2  ;;  %v1285_v26 = vsel %vm1267_vm14, %v1129_v46, %v1284_v7  ;;  %v4368_v56 = vrot.slane %v3797_v41, 2 }
 0x140   :  { %v1030_v31 = vadd.f32 %v4367_v20, %v3758_v60  ;;  %v1138_v51 = vadd.f32 %v1137_v14, %v1136_v25  ;;  %v1039_v4 = vadd.f32 %v1038_v49, %v3789_v11  ;;  %v1054_v53 = vrot.slane %v3837_v30, 2 }
 0x141   :  { %v1046_v38 = vadd.f32 %v4368_v56, %v3797_v41  ;;  %v4369_v57 = vrot.slane %v3842_v58, 4  ;;  %v1147_v5 = vadd.f32 %v1146_v18, %v1145_v42  ;;  %v1154_v12 = vadd.f32 %v1153_v52, %v1152_v40 }
 0x142   :  { %v1286_v39 = vsel %vm1269_vm15, %v1138_v51, %v1285_v26  ;;  %v1070_v3 = vrot.slane %v3869_v19, 4  ;;  %v1055_v8 = vadd.f32 %v1054_v53, %v3837_v30  ;;  %v1078_v2 = vadd.f32 %v3887_v16, %v3884_v32 }
 0x143   :  { %v1062_v60 = vadd.f32 %v4369_v57, %v3842_v58  ;;  %v1047_v24 = vrot.slane %v1046_v38, 1  ;;  %v1155_v41 = vrot.slane %v1154_v12, 1  ;;  %v1287_v29 = vsel %vm1271_vm0, %v1147_v5, %v1286_v39 }
 0x144   :  { %v1071_v22 = vadd.f32 %v1070_v3, %v3869_v19  ;;  %v1275_v58 = vsel %vm1261_vm11, %v1030_v31, %v1021_v36  ;;  %v1056_v17 = vrot.slane %v1055_v8, 1  ;;  %v1079_v1 = vrot.slane %v1078_v2, 4 }
 0x145   :  { %v1063_v11 = vrot.slane %v1062_v60, 2  ;;  %v1048_v59 = vadd.f32 %v1047_v24, %v1046_v38  ;;  %v1222_v25 = vadd.f32 %v3903_v0, %v3893_v27  ;;  %v1156_v43 = vadd.f32 %v1155_v41, %v1154_v12 }
 0x146   :  { %v1072_v30 = vrot.slane %v1071_v22, 2  ;;  %v1276_v34 = vsel %vm1263_vm12, %v1039_v4, %v1275_v58  ;;  %v1057_v23 = vadd.f32 %v1056_v17, %v1055_v8  ;;  %v1080_v16 = vadd.f32 %v1079_v1, %v1078_v2  ;;  %v1425_v1 = vld [vmem:[%s4187_s5 + $0xf] sm:$0xff] }
 0x147   :  { %v1064_v13 = vadd.f32 %v1063_v11, %v1062_v60  ;;  %v1277_v48 = vsel %vm1265_vm13, %v1048_v59, %v1276_v34  ;;  %v1288_v19 = vsel %vm1273_vm1, %v1156_v43, %v1287_v29  ;;  %v1191_v61 = vrot.slane %v3812_v62, 1  ;;  %v1426_v29 = vld [vmem:[%s4187_s5 + $0x17] sm:$0xff] }
 0x148   :  { %v1073_v28 = vadd.f32 %v1072_v30, %v1071_v22  ;;  %v4370_v36 = vrot.slane %v3821_v33, 2  ;;  %v1081_v27 = vrot.slane %v1080_v16, 2  ;;  %v1278_v0 = vsel %vm1267_vm14, %v1057_v23, %v1277_v48  ;;  %v1427_v22 = vld [vmem:[%s4187_s5 + $0x1f] sm:$0xff] }
 0x149   :  { %v1065_v32 = vrot.slane %v1064_v13, 1  ;;  %v1207_v42 = vrot.slane %v3860_v15, 2  ;;  %v1215_v7 = vadd.f32 %v1214_v55, %v3866_v37  ;;  %v1223_v20 = vrot.slane %v1222_v25, 4 }
 0x14a   :  { %v1199_v46 = vadd.f32 %v4370_v36, %v3821_v33  ;;  %v1074_v40 = vrot.slane %v1073_v28, 1  ;;  %v1082_v31 = vadd.f32 %v1081_v27, %v1080_v16  ;;  %v1289_v33 = vsel %vm1261_vm11, %v3771_v10, %v3766_v35 }
 0x14b   :  { %v1066_v14 = vadd.f32 %v1065_v32, %v1064_v13  ;;  %v1208_v51 = vadd.f32 %v1207_v42, %v3860_v15  ;;  %v1192_v52 = vadd.f32 %v1191_v61, %v3812_v62  ;;  %v1216_v26 = vrot.slane %v1215_v7, 2  ;;  %1332 = vxpose.xlu0.b32.start [1/2] (short) (narrow) %v1288_v19, 16  ;;  %v176_v62 = vpop.f32.mrb[1].mxu0  ;;  %v1424_v13 = vld [vmem:[%s4187_s5 + $0x7] sm:$0xff]  ;;  %v2764_v19 = vpop.permute.xlu0 %2763 }
 0x14c   :  { %v1200_v21 = vrot.slane %v1199_v46, 1  ;;  %v1075_v18 = vadd.f32 %v1074_v40, %v1073_v28  ;;  %v1224_v4 = vadd.f32 %v1223_v20, %v1222_v25  ;;  %v1083_v56 = vrot.slane %v1082_v31, 1  ;;  %v2514_v41 = vpop.f32.mrb[2].mxu0 }
 0x14d   :  { %v1279_v49 = vsel %vm1269_vm15, %v1066_v14, %v1278_v0  ;;  %v1209_v53 = vrot.slane %v1208_v51, 1  ;;  %v1290_v37 = vsel %vm1263_vm12, %v3795_v47, %v1289_v33  ;;  %v1217_v57 = vadd.f32 %v1216_v26, %v1215_v7  ;;  %v186_v59 = vpop.f32.mrb[3].mxu0 }
 0x14e   :  { %v1201_v38 = vadd.f32 %v1200_v21, %v1199_v46  ;;  %v1280_v55 = vsel %vm1271_vm0, %v1075_v18, %v1279_v49  ;;  %v1225_v15 = vrot.slane %v1224_v4, 2  ;;  %v1291_v60 = vsel %vm1265_vm13, %v1192_v52, %v1290_v37 }
 0x14f   :  { %v1084_v5 = vadd.f32 %v1083_v56, %v1082_v31  ;;  %v1210_v35 = vadd.f32 %v1209_v53, %v1208_v51  ;;  %v1218_v12 = vrot.slane %v1217_v57, 1  ;;  %v2605_v58 = vpack.c.bf16 %v1427_v22, %v1426_v29 }
 0x150   :  { %v1292_v10 = vsel %vm1267_vm14, %v1201_v38, %v1291_v60  ;;  %v1226_v39 = vadd.f32 %v1225_v15, %v1224_v4  ;;  %v2609_v25 = vpack.c.bf16 %v1425_v1, %v1424_v13  ;;  %v4371_v43 = vlaneseq }
 0x151   :  { %v1281_v3 = vsel %vm1273_vm1, %v1084_v5, %v1280_v55  ;;  %v1293_v24 = vsel %vm1269_vm15, %v1210_v35, %v1292_v10  ;;  %v1219_v8 = vadd.f32 %v1218_v12, %v1217_v57  ;;  %2606 = vmatprep.subr.bf16.mxu1 %v2605_v58  ;;  %v4035_v28 = vunpack.i.l.bf16 %v2764_v19 }
 0x152   :  { %1301 = vxpose.xlu1.b32.end [2/2] (short) (narrow) %v1281_v3, 16  ;;  %v1227_v47 = vrot.slane %v1226_v39, 1  ;;  %2608 = vmatpush3.bf16.msra.mxu1 %v2605_v58  ;;  %v1365_v30 = vand.u32 127, %v4371_v43  ;;  %v4038_v46 = vunpack.i.h.bf16 %v2764_v19  ;;  %v1818_v43 = vld [vmem:[%s4187_s5 + $0x30] sm:$0xff]  ;;  %vm1821_vm9 = vcmask 261120  }
 0x153   :  { %v1294_v2 = vsel %vm1271_vm0, %v1219_v8, %v1293_v24  ;;  %2610 = vmatprep.subr.bf16.mxu1 %v2609_v25 }
 0x154   :  { %v1228_v11 = vadd.f32 %v1227_v47, %v1226_v39  ;;  %vm1366_vm2 = vcmp.eq.s32.totalorder %v4358_v63, %v1365_v30  ;;  %vm1367_vm3 = vcmp.eq.s32.totalorder %v4359_v44, %v1365_v30  ;;  %v2413_v44 = vld [vmem:[%s4187_s5 + $0x6] ss:$0 sm:$0xff] }
 0x155   :  { %v4010_v34 = vsel %vm1366_vm2, 1.0, %v3816_v45  ;;  %v4017_v32 = vsel %vm1366_vm2, 1.0, %v3826_v50  ;;  %v4023_v63 = vsel %vm1367_vm3, 1.0, %v3829_v54  ;;  %v4026_v45 = vsel %vm1367_vm3, 1.0, %v3823_v6 }
 0x156   :  { %v1295_v17 = vsel %vm1273_vm1, %v1228_v11, %v1294_v2  ;;  %2539 = vmatprep.mubr.msk.f32.mxu0 %vm940_vm4, %v4010_v34  ;;  %v1376_v23 = vsel %vm940_vm4, %v4010_v34, 0.0  ;;  %v1382_v16 = vsel %vm940_vm4, %v4017_v32, 0.0  ;;  %v1385_v48 = vsel %vm940_vm4, %v4023_v63, 0.0 }
 0x157   :  { %1333 = vxpose.xlu0.b32.end [2/2] (short) (narrow) %v1295_v17, 16  ;;  %v1379_v50 = vsel %vm940_vm4, %v4026_v45, 0.0  ;;  %v177_v61 = vadd.f32 %v2413_v44, %v176_v62  ;;  %v182_v14 = vadd.f32 %v3910_v9, %v2413_v44  ;;  %v187_v40 = vadd.f32 %v2413_v44, %v186_v59 }
 0x158   :  { %v192_v49 = vadd.f32 %v2514_v41, %v2413_v44 }
 0x159   :  { %v199_v0 = vmul.f32 0.01, %v177_v61  ;;  %vm195_vm5 = vcmp.ge.f32.partialorder %v177_v61, 0.0  ;;  %v200_v31 = vmul.f32 0.01, %v182_v14  ;;  %vm196_vm6 = vcmp.ge.f32.partialorder %v182_v14, 0.0 }
 0x15a   :  { %v201_v33 = vmul.f32 0.01, %v187_v40  ;;  %vm197_vm7 = vcmp.ge.f32.partialorder %v187_v40, 0.0  ;;  %v202_v56 = vmul.f32 0.01, %v192_v49  ;;  %vm198_vm8 = vcmp.ge.f32.partialorder %v192_v49, 0.0 }
 0x15b   :  { %v203_v9 = vsel %vm195_vm5, %v177_v61, %v199_v0  ;;  %v204_v26 = vsel %vm196_vm6, %v182_v14, %v200_v31 }
 0x15c   :  { %v1416_v4 = vmul.f32 %v4035_v28, %v203_v9  ;;  %v205_v38 = vsel %vm197_vm7, %v187_v40, %v201_v33  ;;  %v1417_v53 = vmul.f32 %v4038_v46, %v204_v26  ;;  %v206_v37 = vsel %vm198_vm8, %v192_v49, %v202_v56 }
 0x179   :  { %1377 = vadd.xlane.f32.xlu1 %v1376_v23  ;;  %v1819_v23 = vld [vmem:[%s4187_s5 + $0x38] sm:$0xff] }
 0x17d   :  { %1383 = vadd.xlane.f32.xlu1 %v1382_v16  ;;  %v1820_v16 = vld [vmem:[%s4187_s5 + $0x40] sm:$0xff] }
 0x181   :  { %1386 = vadd.xlane.f32.xlu1 %v1385_v48  ;;  %v2625_v48 = vpack.c.bf16 %v1820_v16, %v1819_v23 }
 0x184   :  { %1380 = vadd.xlane.f32.xlu0 %v1379_v50  ;;  %v2431_v50 = vld [vmem:[%s4187_s5 + $0x27] ss:$0 sm:$0xff] }
 0x1ac   :  { %v2769_v36 = vpop.permute.xlu0 %2768 }
 0x1ad   :  { %v4042_v27 = vunpack.i.l.bf16 %v2769_v36  ;;  %v4047_v51 = vunpack.i.h.bf16 %v2769_v36 }
 0x1af   :  { %v1418_v55 = vmul.f32 %v4042_v27, %v205_v38  ;;  %v1419_v57 = vmul.f32 %v4047_v51, %v206_v37 }
 0x1ce   :  { %v1316_v54 = vpop.trf.xlu1 }
 0x1cf   :  { %v1420_v6 = vmul.f32 %v4035_v28, %v1316_v54 }
 0x1d1   :  { %2519 = vmatprep.mubr.msk.f32.mxu1 %vm940_vm4, %v1420_v6 }
 0x1d2   :  { %v1317_v42 = vpop.trf.xlu1 }
 0x1d3   :  { %v1348_v21 = vpop.trf.xlu0  ;;  %v1421_v7 = vmul.f32 %v4038_v46, %v1317_v42 }
 0x1d4   :  { %v1422_v20 = vmul.f32 %v4042_v27, %v1348_v21 }
 0x1d5   :  { %2520 = vmatmul.mubr.msk.f32.vlgmr.msra.gmra.mrb[0].mxu1 %vm940_vm4, %v1421_v7 }
 0x1d6   :  { %2522 = vmatprep.mubr.msk.f32.mxu1 %vm940_vm4, %v1422_v20  ;;  %2612 = vmatpush3.bf16.msra.mxu1 %v2609_v25  ;;  %v1817_v25 = vld [vmem:[%s4187_s5 + $0x28] sm:$0xff] }
 0x1d7   :  { %v1349_v18 = vpop.trf.xlu0  ;;  %v2621_v30 = vpack.c.bf16 %v1818_v43, %v1817_v25 }
 0x1d8   :  { %v1423_v52 = vmul.f32 %v4047_v51, %v1349_v18 }
 0x1d9   :  { %2622 = vmatprep.subr.bf16.mxu1 %v2621_v30 }
 0x1da   :  { %2523 = vmatmul.mubr.msk.f32.gmra.mrb[2].mxu1 %vm940_vm4, %v1423_v52 }
 0x1db   :  { %2529 = vmatprep.mubr.msk.f32.mxu1 %vm940_vm4, %v1416_v4 }
 0x1de   :  { %2530 = vmatmul.mubr.msk.f32.vlgmr.msra.gmra.mrb[0].mxu1 %vm940_vm4, %v1417_v53 }
 0x1df   :  { %2532 = vmatprep.mubr.msk.f32.mxu1 %vm940_vm4, %v1418_v55  ;;  %2624 = vmatpush3.bf16.msra.mxu1 %v2621_v30 }
 0x1e0   :  { %2626 = vmatprep.subr.bf16.mxu1 %v2625_v48 }
 0x1e2   :  { %2533 = vmatmul.mubr.msk.f32.gmra.mrb[2].mxu1 %vm940_vm4, %v1419_v57 }
 0x1e3   :  { %2628 = vmatpush3.bf16.msra.mxu1 %v2625_v48 }
 0x206   :  { %v1378_v15 = vpop.xlane.xlu1 %1377 }
 0x207   :  { %v1388_v62 = vmax.f32 %v1378_v15, 1.0 }
 0x20a   :  { %v1384_v60 = vpop.xlane.xlu1 %1383 }
 0x20b   :  { %v1390_v39 = vmax.f32 %v1384_v60, 1.0 }
 0x20e   :  { %v1387_v10 = vpop.xlane.xlu1 %1386 }
 0x20f   :  { %v1391_v12 = vmax.f32 %v1387_v10, 1.0 }
 0x211   :  { %v1381_v5 = vpop.xlane.xlu0 %1380 }
 0x212   :  { %v1389_v35 = vmax.f32 %v1381_v5, 1.0 }
 0x214   :  { %2772 = vrsqrt.f32 %v1389_v35 }
 0x215   :  { %2774 = vrsqrt.f32 %v1388_v62 }
 0x216   :  { %2776 = vrsqrt.f32 %v1391_v12 }
 0x217   :  { %2778 = vrsqrt.f32 %v1390_v39  ;;  %v2102_v39 = vld [vmem:[%s4187_s5 + $0x49] sm:$0xff] }
 0x21e   :  { %v4060_v3 = vpop.eup %2772 }
 0x21f   :  { %v4062_v8 = vpop.eup %2774 }
 0x220   :  { %v4065_v2 = vpop.eup %2776 }
 0x221   :  { %v4068_v58 = vpop.eup %2778 }
 0x2b1   :  { %v2531_v24 = vpop.f32.mrb[0].mxu1 }
 0x2b2   :  { %v1624_v47 = vmul.f32 %v4060_v3, %v2531_v24  ;;  %v1603_v11 = vpop.f32.mrb[1].mxu1  ;;  %v2103_v24 = vld [vmem:[%s4187_s5 + $0x51] sm:$0xff] }
 0x2b3   :  { %v1623_v41 = vmul.f32 %v4062_v8, %v1603_v11  ;;  %v2104_v11 = vld [vmem:[%s4187_s5 + $0x59] sm:$0xff] }
 0x2b5   :  { %v2613_v29 = vpack.c.bf16 %v1624_v47, %v1623_v41  ;;  %v2534_v22 = vpop.f32.mrb[2].mxu1  ;;  %v2637_v47 = vpack.c.bf16 %v2103_v24, %v2102_v39  ;;  %v2105_v41 = vld [vmem:[%s4187_s5 + $0x61] sm:$0xff] }
 0x2b6   :  { %v1626_v59 = vmul.f32 %v4065_v2, %v2534_v22  ;;  %v1613_v17 = vpop.f32.mrb[3].mxu1 }
 0x2b7   :  { %v1625_v13 = vmul.f32 %v4068_v58, %v1613_v17  ;;  %2614 = vmatprep.subr.bf16.mxu0 %v2613_v29  ;;  %2638 = vmatprep.subr.bf16.mxu1 %v2637_v47 }
 0x2b8   :  { %2616 = vmatpush3.bf16.msra.mxu0 %v2613_v29  ;;  %v2641_v29 = vpack.c.bf16 %v2105_v41, %v2104_v11 }
 0x2b9   :  { %v2617_v1 = vpack.c.bf16 %v1626_v59, %v1625_v13 }
 0x2bb   :  { %2540 = vmatmul.mubr.msk.f32.vlgmr.msra.gmra.mrb[4].mxu0 %vm940_vm4, %v4026_v45  ;;  %2618 = vmatprep.subr.bf16.mxu0 %v2617_v1 }
 0x2bc   :  { %2620 = vmatpush3.bf16.msra.mxu0 %v2617_v1  ;;  %2546 = vmatprep.mubr.msk.f32.mxu0 %vm940_vm4, %v4017_v32 }
 0x2bf   :  { %2547 = vmatmul.mubr.msk.f32.vlgmr.msra.gmra.mrb[6].mxu0 %vm940_vm4, %v4023_v63 }
 0x2c0   :  { %2567 = vmatprep.mubr.msk.f32.mxu0 %vm940_vm4, %v4010_v34 }
 0x38e   :  { %v2541_v19 = vpop.f32.mrb[4].mxu0 }
 0x38f   :  { %v1790_v44 = vmul.f32 %v4060_v3, %v2541_v19  ;;  %v1699_v54 = vpop.f32.mrb[5].mxu0 }
 0x390   :  { %v1789_v61 = vmul.f32 %v4062_v8, %v1699_v54 }
 0x391   :  { %v1798_v36 = vadd.f32 %v2431_v50, %v1790_v44 }
 0x392   :  { %v1797_v6 = vadd.f32 %v2431_v50, %v1789_v61  ;;  %v2548_v14 = vpop.f32.mrb[6].mxu0 }
 0x393   :  { %v1802_v0 = vmul.f32 %v4038_v46, %v1798_v36  ;;  %v1792_v42 = vmul.f32 %v4065_v2, %v2548_v14  ;;  %v1780_v40 = vpop.f32.mrb[7].mxu0 }
 0x394   :  { %v1801_v21 = vmul.f32 %v4035_v28, %v1797_v6  ;;  %v1791_v7 = vmul.f32 %v4068_v58, %v1780_v40 }
 0x395   :  { %v1810_v20 = vmul.f32 0.01, %v1802_v0  ;;  %v1800_v31 = vadd.f32 %v2431_v50, %v1792_v42  ;;  %vm1806_vm10 = vcmp.ge.f32.partialorder %v1802_v0, 0.0 }
 0x396   :  { %v1799_v49 = vadd.f32 %v2431_v50, %v1791_v7  ;;  %vm1805_vm11 = vcmp.ge.f32.partialorder %v1801_v21, 0.0  ;;  %v1809_v9 = vmul.f32 0.01, %v1801_v21 }
 0x397   :  { %v1804_v33 = vmul.f32 %v4047_v51, %v1800_v31  ;;  %v1814_v26 = vsel %vm1806_vm10, %v1802_v0, %v1810_v20 }
 0x398   :  { %v1803_v18 = vmul.f32 %v4042_v27, %v1799_v49  ;;  %v1813_v52 = vsel %vm1805_vm11, %v1801_v21, %v1809_v9 }
 0x399   :  { %2557 = vmatprep.mubr.msk.f32.mxu1 %vm1821_vm9, %v1813_v52  ;;  %v1812_v4 = vmul.f32 0.01, %v1804_v33  ;;  %vm1808_vm13 = vcmp.ge.f32.partialorder %v1804_v33, 0.0 }
 0x39a   :  { %2558 = vmatmul.mubr.msk.f32.vlgmr.msra.gmra.mrb[4].mxu1 %vm1821_vm9, %v1814_v26  ;;  %vm1807_vm12 = vcmp.ge.f32.partialorder %v1803_v18, 0.0  ;;  %v1811_v56 = vmul.f32 0.01, %v1803_v18 }
 0x39b   :  { %v1816_v53 = vsel %vm1808_vm13, %v1804_v33, %v1812_v4  ;;  %2640 = vmatpush3.bf16.msra.mxu1 %v2637_v47 }
 0x39c   :  { %v1815_v38 = vsel %vm1807_vm12, %v1803_v18, %v1811_v56  ;;  %2642 = vmatprep.subr.bf16.mxu1 %v2641_v29 }
 0x39d   :  { %2560 = vmatprep.mubr.msk.f32.mxu1 %vm1821_vm9, %v1815_v38  ;;  %v2449_v38 = vld [vmem:[%s4187_s5 + $0x69] ss:$0 sm:$0xff] }
 0x39e   :  { %2561 = vmatmul.mubr.msk.f32.gmra.mrb[6].mxu1 %vm1821_vm9, %v1816_v53 }
 0x39f   :  { %2644 = vmatpush3.bf16.msra.mxu1 %v2641_v29 }
 0x46d   :  { %v2559_v37 = vpop.f32.mrb[4].mxu1 }
 0x46e   :  { %v1921_v55 = vmul.f32 %v4060_v3, %v2559_v37  ;;  %v1900_v57 = vpop.f32.mrb[5].mxu1 }
 0x46f   :  { %v1920_v15 = vmul.f32 %v4062_v8, %v1900_v57 }
 0x471   :  { %v2629_v60 = vpack.c.bf16 %v1921_v55, %v1920_v15  ;;  %v2562_v5 = vpop.f32.mrb[6].mxu1 }
 0x472   :  { %v1923_v35 = vmul.f32 %v4065_v2, %v2562_v5  ;;  %v1910_v10 = vpop.f32.mrb[7].mxu1 }
 0x473   :  { %v1922_v62 = vmul.f32 %v4068_v58, %v1910_v10  ;;  %2630 = vmatprep.subr.bf16.mxu0 %v2629_v60 }
 0x474   :  { %2632 = vmatpush3.bf16.msra.mxu0 %v2629_v60 }
 0x475   :  { %v2633_v12 = vpack.c.bf16 %v1923_v35, %v1922_v62 }
 0x477   :  { %2568 = vmatmul.mubr.msk.f32.vlgmr.msra.gmra.mrb[8].mxu0 %vm940_vm4, %v4026_v45  ;;  %2634 = vmatprep.subr.bf16.mxu0 %v2633_v12 }
 0x478   :  { %2636 = vmatpush3.bf16.msra.mxu0 %v2633_v12  ;;  %2574 = vmatprep.mubr.msk.f32.mxu0 %vm940_vm4, %v4017_v32 }
 0x47b   :  { %2575 = vmatmul.mubr.msk.f32.vlgmr.msra.gmra.mrb[10].mxu0 %vm940_vm4, %v4023_v63 }
 0x47c   :  { %2595 = vmatprep.mubr.msk.f32.mxu0 %vm940_vm4, %v4010_v34  ;;  %v2440_v34 = vld [vmem:[%s4187_s5 + $0x48] ss:$0 sm:$0xff]  ;;  %s2877_s5 = smov [#allocation9]  }
 0x47d   :  { %s2395_s4 = sshll.u32 %s2877_s5, 4  ;;  %s2396_s4 = int_to_ptr.vmem [resolvable:$true] %s2395_s4 }
 0x47e   :  { %s2840_s19 = scalar_lea.vmem %s2396_s4, 512  ;;  %p2845_p8 = scmp.lt.s32.totalorder %s2396_s4, %s2396_s4 }
 0x47f   :  { %p2841_p7 = scmp.ne.s32.totalorder %s2396_s4, %s2840_s19  ;;  %p2846_p9 = scmp.lt.s32.totalorder %s2840_s19, %s2840_s19 }
 0x481   :  { %p2847_p10 = por %p2846_p9, %p2845_p8 }
 0x483   :  { %p2848_p11 = pnand %p2847_p10, %p2841_p7 }
 0x54a   :  { %v2569_v22 = vpop.f32.mrb[8].mxu0 }
 0x54b   :  { %v2075_v59 = vmul.f32 %v4060_v3, %v2569_v22  ;;  %v1990_v17 = vpop.f32.mrb[9].mxu0 }
 0x54c   :  { %v2074_v13 = vmul.f32 %v4062_v8, %v1990_v17 }
 0x54d   :  { %v2083_v1 = vadd.f32 %v2440_v34, %v2075_v59 }
 0x54e   :  { %v2082_v25 = vadd.f32 %v2440_v34, %v2074_v13  ;;  %v2576_v43 = vpop.f32.mrb[10].mxu0 }
 0x54f   :  { %v2087_v30 = vmul.f32 %v4038_v46, %v2083_v1  ;;  %v2077_v23 = vmul.f32 %v4065_v2, %v2576_v43  ;;  %v2065_v16 = vpop.f32.mrb[11].mxu0 }
 0x550   :  { %v2086_v48 = vmul.f32 %v4035_v28, %v2082_v25  ;;  %v2076_v50 = vmul.f32 %v4068_v58, %v2065_v16 }
 0x551   :  { %v2095_v19 = vmul.f32 0.01, %v2087_v30  ;;  %v2085_v44 = vadd.f32 %v2440_v34, %v2077_v23  ;;  %vm2091_vm14 = vcmp.ge.f32.partialorder %v2087_v30, 0.0 }
 0x552   :  { %v2084_v54 = vadd.f32 %v2440_v34, %v2076_v50  ;;  %vm2090_vm15 = vcmp.ge.f32.partialorder %v2086_v48, 0.0  ;;  %v2094_v61 = vmul.f32 0.01, %v2086_v48 }
 0x553   :  { %v2089_v36 = vmul.f32 %v4047_v51, %v2085_v44  ;;  %v2099_v0 = vsel %vm2091_vm14, %v2087_v30, %v2095_v19 }
 0x554   :  { %v2088_v6 = vmul.f32 %v4042_v27, %v2084_v54  ;;  %v2098_v14 = vsel %vm2090_vm15, %v2086_v48, %v2094_v61 }
 0x555   :  { %2585 = vmatprep.mubr.msk.f32.mxu1 %vm1821_vm9, %v2098_v14  ;;  %v2097_v42 = vmul.f32 0.01, %v2089_v36  ;;  %vm2093_vm1 = vcmp.ge.f32.partialorder %v2089_v36, 0.0 }
 0x556   :  { %2586 = vmatmul.mubr.msk.f32.vlgmr.msra.gmra.mrb[8].mxu1 %vm1821_vm9, %v2099_v0  ;;  %vm2092_vm0 = vcmp.ge.f32.partialorder %v2088_v6, 0.0  ;;  %v2096_v40 = vmul.f32 0.01, %v2088_v6 }
 0x557   :  { %v2101_v7 = vsel %vm2093_vm1, %v2089_v36, %v2097_v42 }
 0x558   :  { %v2100_v21 = vsel %vm2092_vm0, %v2088_v6, %v2096_v40 }
 0x559   :  { %2588 = vmatprep.mubr.msk.f32.mxu1 %vm1821_vm9, %v2100_v21 }
 0x55a   :  { %2589 = vmatmul.mubr.msk.f32.gmra.mrb[10].mxu1 %vm1821_vm9, %v2101_v7 }
 0x629   :  { %v2587_v20 = vpop.f32.mrb[8].mxu1 }
 0x62a   :  { %v2205_v31 = vmul.f32 %v4060_v3, %v2587_v20  ;;  %v2184_v49 = vpop.f32.mrb[9].mxu1 }
 0x62b   :  { %v2204_v9 = vmul.f32 %v4062_v8, %v2184_v49 }
 0x62d   :  { %v2645_v33 = vpack.c.bf16 %v2205_v31, %v2204_v9  ;;  %v2590_v18 = vpop.f32.mrb[10].mxu1 }
 0x62e   :  { %v2207_v52 = vmul.f32 %v4065_v2, %v2590_v18  ;;  %v2194_v26 = vpop.f32.mrb[11].mxu1 }
 0x62f   :  { %v2206_v4 = vmul.f32 %v4068_v58, %v2194_v26  ;;  %2646 = vmatprep.subr.bf16.mxu0 %v2645_v33 }
 0x630   :  { %2648 = vmatpush3.bf16.msra.mxu0 %v2645_v33 }
 0x631   :  { %v2649_v56 = vpack.c.bf16 %v2207_v52, %v2206_v4 }
 0x633   :  { %2596 = vmatmul.mubr.msk.f32.vlgmr.msra.gmra.mrb[12].mxu0 %vm940_vm4, %v4026_v45  ;;  %2650 = vmatprep.subr.bf16.mxu0 %v2649_v56 }
 0x634   :  { %2652 = vmatpush3.bf16.msra.mxu0 %v2649_v56  ;;  %2602 = vmatprep.mubr.msk.f32.mxu0 %vm940_vm4, %v4017_v32 }
 0x637   :  { %2603 = vmatmul.mubr.msk.f32.vlgmr.msra.gmra.mrb[14].mxu0 %vm940_vm4, %v4023_v63 }
 0x706   :  { %v2597_v53 = vpop.f32.mrb[12].mxu0 }
 0x707   :  { %v2359_v37 = vmul.f32 %v4060_v3, %v2597_v53  ;;  %v2274_v55 = vpop.f32.mrb[13].mxu0 }
 0x708   :  { %v2358_v57 = vmul.f32 %v4062_v8, %v2274_v55 }
 0x709   :  { %v2367_v15 = vadd.f32 %v2449_v38, %v2359_v37 }
 0x70a   :  { %v2366_v45 = vadd.f32 %v2449_v38, %v2358_v57  ;;  %v2604_v60 = vpop.f32.mrb[14].mxu0 }
 0x70b   :  { %v2371_v5 = vmul.f32 %v4038_v46, %v2367_v15  ;;  %v2361_v32 = vmul.f32 %v4065_v2, %v2604_v60  ;;  %v2349_v35 = vpop.f32.mrb[15].mxu0 }
 0x70c   :  { %v2370_v63 = vmul.f32 %v4035_v28, %v2366_v45  ;;  %v2360_v10 = vmul.f32 %v4068_v58, %v2349_v35 }
 0x70d   :  { %vm2375_vm4 = vcmp.ge.f32.partialorder %v2371_v5, 0.0  ;;  %v2379_v62 = vmul.f32 0.01, %v2371_v5  ;;  %v2369_v12 = vadd.f32 %v2449_v38, %v2361_v32 }
 0x70e   :  { %vm2374_vm2 = vcmp.ge.f32.partialorder %v2370_v63, 0.0  ;;  %v2378_v3 = vmul.f32 0.01, %v2370_v63  ;;  %v2368_v39 = vadd.f32 %v2449_v38, %v2360_v10 }
 0x70f   :  { %v2383_v24 = vsel %vm2375_vm4, %v2371_v5, %v2379_v62  ;;  %v2373_v8 = vmul.f32 %v4047_v51, %v2369_v12 }
 0x710   :  { %2387 = vst [vmem:[#allocation9 + $0x8] sm:$0xff] %v2383_v24  ;;  %v2382_v47 = vsel %vm2374_vm2, %v2370_v63, %v2378_v3  ;;  %v2372_v46 = vmul.f32 %v4042_v27, %v2368_v39 }
 0x711   :  { %2386 = vst [vmem:[#allocation9] sm:$0xff] %v2382_v47  ;;  %vm2377_vm3 = vcmp.ge.f32.partialorder %v2373_v8, 0.0  ;;  %v2381_v28 = vmul.f32 0.01, %v2373_v8 }
 0x712   :  { %vm2376_vm5 = vcmp.ge.f32.partialorder %v2372_v46, 0.0  ;;  %v2380_v2 = vmul.f32 0.01, %v2372_v46 }
 0x713   :  { %v2385_v58 = vsel %vm2377_vm3, %v2373_v8, %v2381_v28 }
 0x714   :  { %2389 = vst [vmem:[#allocation9 + $0x18] sm:$0xff] %v2385_v58  ;;  %v2384_v11 = vsel %vm2376_vm5, %v2372_v46, %v2380_v2 }
 0x715   :  { %2388 = vst [vmem:[#allocation9 + $0x10] sm:$0xff] %v2384_v11 }
 0x716   :  { %2851 = shalt.err (!%p2848_p11)
}
 0x717   :  { %s2852_s22 = scalar_lea.hbm %s4188_s6, 512 }
 0x718   :  { %p2853_p12 = scmp.ne.s32.totalorder %s4188_s6, %s2852_s22  ;;  %p2856_p13 = scmp.lt.u32.totalorder %s2852_s22, %s4188_s6 }
 0x71a   :  { %p2858_p0 = pnand %p2856_p13, %p2853_p12 }
 0x71c   :  { %2861 = shalt.err (!%p2858_p0)
}
 0x71d   :  { %2401 = dma.vmem_to_hbm [thread:$0]  %s2396_s4, 512, %s4188_s6, [#allocation6], %s2872_s11, %s2872_s11, %s2873_s12  }
 0x71e   :  { %2868 = dma.done.wait [#allocation6], 512  }
 0x71f   :  { %2869 = vsyncadd [#allocation6], 4294966784 }
 0x720   :  { %2405 = vsyncpa [#allocation5], 1 }
 0x721   :  { %2406 = vsyncpa [#allocation8], 1 }
 0x722   :  { %2407 = vsyncpa [#allocation6], 1 }

</bundles_post_ra>
